<compile_context>
chip_gen: v7x
topology: tpu7x:2x2x1
jax: 0.10.0
libtpu: 0.0.40
codegen_flags: <defaults>
</compile_context>

<pallas_src>
import functools

import jax
import jax.numpy as jnp
from jax.experimental import pallas as pl
from jax.experimental.pallas import tpu as pltpu


# ---------------------------------------------------------------------------
# Helpers
# ---------------------------------------------------------------------------
def _round_up(v, m):
    return ((v + m - 1) // m) * m


_VMEM_LIMIT_CACHE = None


def _vmem_limit_bytes():
    """Generation-aware VMEM budget: ~3/4 of physical, capped at 96 MiB."""
    global _VMEM_LIMIT_CACHE
    if _VMEM_LIMIT_CACHE is None:
        try:
            cap = pltpu.get_tpu_info().vmem_capacity_bytes
        except Exception:
            cap = 64 * 1024 * 1024
        _VMEM_LIMIT_CACHE = int(min(96 * 1024 * 1024, (cap * 3) // 4))
    return _VMEM_LIMIT_CACHE


def _pick_c_chunk(c):
    """Hidden-channel chunk size: full extent, or a multiple of 128."""
    if c <= 256:
        return c
    for t in (256, 128):
        if c % t == 0:
            return t
    return c


def fold_bn(w, gamma, beta, mean, var, eps=1e-5):
    s = gamma / jnp.sqrt(var + eps)
    return w * s[:, None], (beta - mean * s)[:, None]


# ---------------------------------------------------------------------------
# Fused kernel: conv1(+BN+SiLU) -> SPPF-chained max pools -> conv2(+BN+SiLU)
# ---------------------------------------------------------------------------
def _spp_fused_kernel(col_ref, x_ref, w1_ref, b1_ref, w2_ref, b2_ref, o_ref,
                      pad_ref, acc_ref, *, W, P, NPOOL, PAD, HWP, HAS_TAIL):
    cidx = pl.program_id(1)                     # hidden-channel chunk (reduction)
    hw = HWP
    cdt = pad_ref.dtype                         # compute dtype for pool/matmul
    minus_inf = jnp.array(-jnp.inf, dtype=cdt)

    # Per-image init (gated on the reduction axis only, so it stays correct if
    # the parallel batch axis is sharded across TensorCores):
    #   * -inf borders of the shift scratch (borders only, written once)
    #   * zero the conv2 accumulator
    @pl.when(cidx == 0)
    def _():
        cc = pad_ref.shape[0]
        pad_ref[:, :PAD] = jnp.full((cc, PAD), -jnp.inf, dtype=cdt)
        pad_ref[:, PAD + hw:] = jnp.full((cc, PAD), -jnp.inf, dtype=cdt)
        acc_ref[...] = jnp.zeros_like(acc_ref)

    # Hoisted column-boundary masks, shared by every pool application.
    col = col_ref[...]                                   # (1, HWP) int32
    lt = [col < (W - dj) for dj in range(1, P + 1)]      # +dj shift validity
    ge = [col >= dj for dj in range(1, P + 1)]           # -dj shift validity
    valid = (col >= 0) if HAS_TAIL else None             # real (non-pad) pixels

    def pool_same(v):
        # Stride-1 'same' (2P+1)x(2P+1) max pool on the flattened (Cc, H*W) map.
        # Every shifted window is read straight from the ref (offset loads).
        pad_ref[:, PAD:PAD + hw] = v
        rows = v
        for di in range(1, P + 1):              # H direction: +-di*W shifts
            rows = jnp.maximum(rows, pad_ref[:, PAD + di * W: PAD + di * W + hw])
            rows = jnp.maximum(rows, pad_ref[:, PAD - di * W: PAD - di * W + hw])
        pad_ref[:, PAD:PAD + hw] = rows
        out = rows
        for dj in range(1, P + 1):              # W direction: +-dj, row-masked
            out = jnp.maximum(
                out, jnp.where(lt[dj - 1],
                               pad_ref[:, PAD + dj: PAD + dj + hw], minus_inf))
            out = jnp.maximum(
                out, jnp.where(ge[dj - 1],
                               pad_ref[:, PAD - dj: PAD - dj + hw], minus_inf))
        if HAS_TAIL:
            # Keep the lane-padding tail at -inf so chained pools stay exact.
            out = jnp.where(valid, out, minus_inf)
        return out

    # conv1: 1x1 conv + folded BN + SiLU, fused (no HBM round trip for y).
    z = jnp.dot(w1_ref[...], x_ref[0], preferred_element_type=jnp.float32)
    z = z + b1_ref[...]
    y = z * jax.nn.sigmoid(z)
    if HAS_TAIL:
        y = jnp.where(valid, y, -jnp.inf)
    y = y.astype(cdt)

    # conv2 accumulated over the (NPOOL+1) concat channel groups (SPPF chain:
    # k = 5, 9, 13 == pool5^g); the concatenated tensor never exists.
    acc_ref[...] += jnp.dot(w2_ref[0], y, preferred_element_type=jnp.float32)
    branch = y
    for g in range(1, NPOOL + 1):
        branch = pool_same(branch)
        acc_ref[...] += jnp.dot(w2_ref[g], branch,
                                preferred_element_type=jnp.float32)

    # Finalize on the last channel chunk: bias + SiLU, lane-dense store.
    @pl.when(cidx == pl.num_programs(1) - 1)
    def _():
        z2 = acc_ref[...] + b2_ref[...]
        o_ref[0] = (z2 * jax.nn.sigmoid(z2)).astype(o_ref.dtype)


def _spp_call(x2, col, w1, b1, w2g, b2, *, H, W, P, npool, hw_p, pad,
              c_chunk, out_dtype, compute_dtype, use_buffered):
    n, cin, _ = x2.shape
    chid = w1.shape[0]
    cout = w2g.shape[1]
    n_chunks = chid // c_chunk

    def spec(shape, idx, constant):
        if constant and use_buffered:
            # Constant-index block -> single buffer (frees VMEM, esp. on v7x).
            return pl.BlockSpec(shape, idx, pipeline_mode=pl.Buffered(1))
        return pl.BlockSpec(shape, idx)

    wconst = (n_chunks == 1)        # weight blocks constant iff a single chunk

    in_specs = [
        spec((1, hw_p), lambda i, c: (0, 0), True),                      # col
        spec((1, cin, hw_p), lambda i, c: (i, 0, 0), False),             # x
        spec((c_chunk, cin), lambda i, c: (c, 0), wconst),               # W1
        spec((c_chunk, 1), lambda i, c: (c, 0), wconst),                 # b1
        spec((npool + 1, cout, c_chunk), lambda i, c: (0, 0, c), wconst),  # W2
        spec((cout, 1), lambda i, c: (0, 0), True),                      # b2
    ]

    esz = jnp.dtype(compute_dtype).itemsize
    cost = pl.CostEstimate(
        flops=n * hw_p * (2 * chid * cin + 2 * cout * (npool + 1) * chid
                          + 4 * P * npool * chid),
        transcendentals=n * hw_p * (chid + cout),
        bytes_accessed=(n * cin * hw_p + chid * cin
                        + cout * (npool + 1) * chid) * esz
                       + (chid + cout) * 4
                       + n * cout * hw_p * jnp.dtype(out_dtype).itemsize)

    kern = functools.partial(
        _spp_fused_kernel, W=W, P=P, NPOOL=npool, PAD=pad, HWP=hw_p,
        HAS_TAIL=(hw_p != H * W))

    return pl.pallas_call(
        kern,
        out_shape=jax.ShapeDtypeStruct((n, cout, hw_p), out_dtype),
        grid_spec=pltpu.PrefetchScalarGridSpec(
            num_scalar_prefetch=0,
            grid=(n, n_chunks),
            in_specs=in_specs,
            out_specs=pl.BlockSpec((1, cout, hw_p), lambda i, c: (i, 0, 0)),
            scratch_shapes=[
                pltpu.VMEM((c_chunk, pad + hw_p + pad), compute_dtype),  # shift
                pltpu.VMEM((cout, hw_p), jnp.float32),                   # acc
            ]),
        compiler_params=pltpu.CompilerParams(
            dimension_semantics=("parallel", "arbitrary"),
            vmem_limit_bytes=_vmem_limit_bytes()),
        cost_estimate=cost,
    )(col, x2, w1, b1, w2g, b2)


# ---------------------------------------------------------------------------
# Public forward
# ---------------------------------------------------------------------------
def spp_bottleneck(x, params, ksizes=(5, 9, 13), compute_dtype=None):
    """SPPBottleneck forward (eval-mode BN folded into the 1x1 convs)."""
    p = ksizes[0] // 2
    # SPPF chaining is exact only for ksizes = (2p+1, 4p+1, 6p+1, ...).
    assert tuple(ksizes) == tuple(2 * p * (i + 1) + 1
                                  for i in range(len(ksizes))), ksizes
    n, cin, h, w = x.shape
    out_dtype = x.dtype
    cdt = jnp.dtype(out_dtype if compute_dtype is None else compute_dtype)

    w1, b1 = fold_bn(params["w1"], params["g1"], params["be1"],
                     params["m1"], params["v1"])
    w2, b2 = fold_bn(params["w2"], params["g2"], params["be2"],
                     params["m2"], params["v2"])
    chid, cout, npool = w1.shape[0], w2.shape[0], len(ksizes)

    hw_r = h * w
    hw_p = _round_up(hw_r, 128)                 # lane-dense spatial extent
    pad = max(128, _round_up(p * w, 128))       # -inf border for row shifts

    x2 = x.reshape(n, cin, hw_r)
    if hw_p != hw_r:
        x2 = jnp.pad(x2, ((0, 0), (0, 0), (0, hw_p - hw_r)))
    x2 = x2.astype(cdt)

    w1c = w1.astype(cdt)
    # Group-major conv2 weights: (NPOOL+1, Cout, Chid), contiguous per chunk.
    w2g = jnp.transpose(w2.reshape(cout, npool + 1, chid), (1, 0, 2)).astype(cdt)
    b1c = b1.astype(jnp.float32)
    b2c = b2.astype(jnp.float32)

    # Column index of each (padded) pixel; -1 marks lane-padding tail pixels.
    col = jnp.tile(jnp.arange(w, dtype=jnp.int32), h)
    col = jnp.pad(col, (0, hw_p - hw_r), constant_values=-1).reshape(1, hw_p)

    c_chunk = _pick_c_chunk(chid)
    kwargs = dict(H=h, W=w, P=p, npool=npool, hw_p=hw_p, pad=pad,
                  c_chunk=c_chunk, out_dtype=out_dtype, compute_dtype=cdt)
    try:
        o2 = _spp_call(x2, col, w1c, b1c, w2g, b2c, use_buffered=True, **kwargs)
    except Exception:
        # pl.Buffered(1) single-buffering unsupported on this jax build ->
        # fall back to default double buffering.
        o2 = _spp_call(x2, col, w1c, b1c, w2g, b2c, use_buffered=False, **kwargs)

    if hw_p != hw_r:
        o2 = o2[:, :, :hw_r]
    return o2.reshape(n, cout, h, w)


# ---------------------------------------------------------------------------
# Pure-JAX reference (true k=5/9/13 windows; validates SPPF chaining)
# ---------------------------------------------------------------------------
def spp_bottleneck_ref(x, params, ksizes=(5, 9, 13)):
    def conv(xx, w, b):
        z = jnp.einsum("oc,nchw->nohw", w, xx,
                       precision=jax.lax.Precision.HIGHEST)
        z = z + b[:, 0][None, :, None, None]
        return z * jax.nn.sigmoid(z)

    def pool(xx, k):
        p = k // 2
        return jax.lax.reduce_window(xx, -jnp.inf, jax.lax.max,
                                     (1, 1, k, k), (1, 1, 1, 1),
                                     ((0, 0), (0, 0), (p, p), (p, p)))

    w1, b1 = fold_bn(params["w1"], params["g1"], params["be1"],
                     params["m1"], params["v1"])
    w2, b2 = fold_bn(params["w2"], params["g2"], params["be2"],
                     params["m2"], params["v2"])
    y = conv(x, w1, b1)
    cat = jnp.concatenate([y] + [pool(y, k) for k in ksizes], axis=1)
    return conv(cat, w2, b2)


if __name__ == "__main__":
    key = jax.random.PRNGKey(0)
    keys = jax.random.split(key, 12)

    N, Cin, H, W = 2, 4, 16, 16
    Cout = 4
    hidden = Cin // 2                       # 2
    ksizes = (5, 9, 13)
    conv2_cin = hidden * (len(ksizes) + 1)  # 8

    x = jax.random.normal(keys[0], (N, Cin, H, W), jnp.float32)

    params = dict(
        # conv1: Conv2d(Cin, hidden, 1, bias=False) + BN(hidden)
        w1=jax.random.normal(keys[1], (hidden, Cin), jnp.float32) * 0.5,
        g1=jax.random.uniform(keys[2], (hidden,), minval=0.5, maxval=1.5),
        be1=jax.random.normal(keys[3], (hidden,)) * 0.1,
        m1=jax.random.normal(keys[4], (hidden,)) * 0.1,
        v1=jax.random.uniform(keys[5], (hidden,), minval=0.5, maxval=1.5),
        # conv2: Conv2d(4*hidden, Cout, 1, bias=False) + BN(Cout)
        w2=jax.random.normal(keys[6], (Cout, conv2_cin), jnp.float32) * 0.5,
        g2=jax.random.uniform(keys[7], (Cout,), minval=0.5, maxval=1.5),
        be2=jax.random.normal(keys[8], (Cout,)) * 0.1,
        m2=jax.random.normal(keys[9], (Cout,)) * 0.1,
        v2=jax.random.uniform(keys[10], (Cout,), minval=0.5, maxval=1.5),
    )

    ref = jax.block_until_ready(spp_bottleneck_ref(x, params, ksizes))

    # f32 path (default)
    out = jax.block_until_ready(spp_bottleneck(x, params, ksizes))
    assert out.shape == (N, Cout, H, W), out.shape
    assert jnp.allclose(out, ref, atol=2e-3, rtol=2e-3), \
        float(jnp.max(jnp.abs(out - ref)))

    # bf16 MXU-operand path (accumulation / bias / SiLU stay f32)
    out_bf = jax.block_until_ready(
        spp_bottleneck(x, params, ksizes, compute_dtype=jnp.bfloat16))
    assert out_bf.shape == (N, Cout, H, W), out_bf.shape
    assert jnp.allclose(out_bf, ref, atol=1e-1, rtol=1e-1), \
        float(jnp.max(jnp.abs(out_bf - ref)))

    # Non-multiple-of-128 spatial map exercises the lane-padding (-inf tail) path.
    x_odd = jax.random.normal(keys[11], (1, Cin, 10, 10), jnp.float32)
    out_odd = jax.block_until_ready(spp_bottleneck(x_odd, params, ksizes))
    ref_odd = jax.block_until_ready(spp_bottleneck_ref(x_odd, params, ksizes))
    assert out_odd.shape == (1, Cout, 10, 10), out_odd.shape
    assert jnp.allclose(out_odd, ref_odd, atol=2e-3, rtol=2e-3), \
        float(jnp.max(jnp.abs(out_odd - ref_odd)))

    print("KERNEL_OK")
</pallas_src>

<mosaic_0001>
module attributes {stable_mosaic.version = 11 : i64} {
  func.func @_spp_fused_kernel(%arg0: i32, %arg1: i32, %arg2: memref<1x256xi32, #tpu.memory_space<vmem>>, %arg3: memref<1x4x256xf32, #tpu.memory_space<vmem>>, %arg4: memref<2x4xf32, #tpu.memory_space<vmem>>, %arg5: memref<2x1xf32, #tpu.memory_space<vmem>>, %arg6: memref<4x4x2xf32, #tpu.memory_space<vmem>>, %arg7: memref<4x1xf32, #tpu.memory_space<vmem>>, %arg8: memref<1x4x256xf32, #tpu.memory_space<vmem>>, %arg9: memref<2x512xf32, #tpu.memory_space<vmem>>, %arg10: memref<4x256xf32, #tpu.memory_space<vmem>>) attributes {dimension_semantics = [#tpu.dimension_semantics<parallel>, #tpu.dimension_semantics<arbitrary>], iteration_bounds = array<i64: 2, 1>, scalar_prefetch = 0 : i64, scratch_operands = 2 : i64, tpu.core_type = #tpu.core_type<tc>, window_params = [{pipeline_mode = #tpu.pipeline_mode<synchronous>, transform_indices = @transform_0, window_bounds = array<i64: 1, 256>}, {transform_indices = @transform_1, window_bounds = array<i64: 1, 4, 256>}, {pipeline_mode = #tpu.pipeline_mode<synchronous>, transform_indices = @transform_2, window_bounds = array<i64: 2, 4>}, {pipeline_mode = #tpu.pipeline_mode<synchronous>, transform_indices = @transform_3, window_bounds = array<i64: 2, 1>}, {pipeline_mode = #tpu.pipeline_mode<synchronous>, transform_indices = @transform_4, window_bounds = array<i64: 4, 4, 2>}, {pipeline_mode = #tpu.pipeline_mode<synchronous>, transform_indices = @transform_5, window_bounds = array<i64: 4, 1>}, {transform_indices = @transform_6, window_bounds = array<i64: 1, 4, 256>}]} {
    %c0_i32 = arith.constant 0 : i32
    %0 = arith.cmpi eq, %arg1, %c0_i32 : i32
    %1 = arith.extui %0 : i1 to i32
    %c0_i32_0 = arith.constant 0 : i32
    %2 = arith.cmpi ne, %1, %c0_i32_0 : i32
    scf.if %2 {
      %cst_104 = arith.constant 0xFF800000 : f32
      %154 = vector.broadcast %cst_104 : f32 to vector<2x128xf32>
      %c0_105 = arith.constant 0 : index
      %c0_106 = arith.constant 0 : index
      %155 = vector.load %arg9[%c0_105, %c0_106] : memref<2x512xf32, #tpu.memory_space<vmem>>, vector<2x128xf32>
      tpu.vector_store %arg9[%c0_105, %c0_106], %154 {strides = array<i32>} : memref<2x512xf32, #tpu.memory_space<vmem>>, vector<2x128xf32>,
      %cst_107 = arith.constant 0xFF800000 : f32
      %156 = vector.broadcast %cst_107 : f32 to vector<2x128xf32>
      %c0_108 = arith.constant 0 : index
      %c384 = arith.constant 384 : index
      %157 = vector.load %arg9[%c0_108, %c384] : memref<2x512xf32, #tpu.memory_space<vmem>>, vector<2x128xf32>
      tpu.vector_store %arg9[%c0_108, %c384], %156 {strides = array<i32>} : memref<2x512xf32, #tpu.memory_space<vmem>>, vector<2x128xf32>,
      %cst_109 = arith.constant 0.000000e+00 : f32
      %158 = vector.broadcast %cst_109 : f32 to vector<4x256xf32>
      %c0_110 = arith.constant 0 : index
      %c0_111 = arith.constant 0 : index
      %159 = vector.load %arg10[%c0_110, %c0_111] : memref<4x256xf32, #tpu.memory_space<vmem>>, vector<4x256xf32>
      tpu.vector_store %arg10[%c0_110, %c0_111], %158 {strides = array<i32>} : memref<4x256xf32, #tpu.memory_space<vmem>>, vector<4x256xf32>,
    } else {
    }
    %c0 = arith.constant 0 : index
    %c0_1 = arith.constant 0 : index
    %3 = vector.load %arg2[%c0, %c0_1] : memref<1x256xi32, #tpu.memory_space<vmem>>, vector<1x256xi32>
    %c15_i32 = arith.constant 15 : i32
    %4 = vector.broadcast %c15_i32 : i32 to vector<1x256xi32>
    %5 = arith.cmpi slt, %3, %4 : vector<1x256xi32>
    %c14_i32 = arith.constant 14 : i32
    %6 = vector.broadcast %c14_i32 : i32 to vector<1x256xi32>
    %7 = arith.cmpi slt, %3, %6 : vector<1x256xi32>
    %c1_i32 = arith.constant 1 : i32
    %8 = vector.broadcast %c1_i32 : i32 to vector<1x256xi32>
    %9 = arith.cmpi sge, %3, %8 : vector<1x256xi32>
    %c2_i32 = arith.constant 2 : i32
    %10 = vector.broadcast %c2_i32 : i32 to vector<1x256xi32>
    %11 = arith.cmpi sge, %3, %10 : vector<1x256xi32>
    %c0_2 = arith.constant 0 : index
    %c0_3 = arith.constant 0 : index
    %12 = vector.load %arg4[%c0_2, %c0_3] : memref<2x4xf32, #tpu.memory_space<vmem>>, vector<2x4xf32>
    %c0_4 = arith.constant 0 : index
    %c0_5 = arith.constant 0 : index
    %c0_6 = arith.constant 0 : index
    %13 = vector.load %arg3[%c0_4, %c0_5, %c0_6] : memref<1x4x256xf32, #tpu.memory_space<vmem>>, vector<1x4x256xf32>
    %14 = vector.shape_cast %13 : vector<1x4x256xf32> to vector<4x256xf32>
    %cst = arith.constant dense<0.000000e+00> : vector<2x256xf32>
    %15 = tpu.matmul %12, %14, %cst {dimension_numbers = #tpu.dot_dimension_numbers<[1], [0], [0], [1], [0, 0, 1, 1], [], []>} : vector<2x4xf32>, vector<4x256xf32>, vector<2x256xf32> -> vector<2x256xf32>
    %c0_7 = arith.constant 0 : index
    %c0_8 = arith.constant 0 : index
    %16 = vector.load %arg5[%c0_7, %c0_8] : memref<2x1xf32, #tpu.memory_space<vmem>>, vector<2x1xf32>
    %17 = vector.broadcast %16 : vector<2x1xf32> to vector<2x256xf32>
    %18 = arith.addf %15, %17 : vector<2x256xf32>
    %19 = arith.negf %18 : vector<2x256xf32>
    %20 = math.exp %19 : vector<2x256xf32>
    %cst_9 = arith.constant 1.000000e+00 : f32
    %21 = vector.broadcast %cst_9 : f32 to vector<2x256xf32>
    %22 = arith.addf %21, %20 : vector<2x256xf32>
    %23 = arith.divf %21, %22 : vector<2x256xf32>
    %24 = arith.mulf %18, %23 : vector<2x256xf32>
    %c0_10 = arith.constant 0 : index
    %c0_11 = arith.constant 0 : index
    %25 = vector.load %arg10[%c0_10, %c0_11] : memref<4x256xf32, #tpu.memory_space<vmem>>, vector<4x256xf32>
    %c0_12 = arith.constant 0 : index
    %c0_13 = arith.constant 0 : index
    %c0_14 = arith.constant 0 : index
    %26 = vector.load %arg6[%c0_12, %c0_13, %c0_14] : memref<4x4x2xf32, #tpu.memory_space<vmem>>, vector<1x4x2xf32>
    %27 = vector.shape_cast %26 : vector<1x4x2xf32> to vector<4x2xf32>
    %cst_15 = arith.constant dense<0.000000e+00> : vector<4x256xf32>
    %28 = tpu.matmul %27, %24, %cst_15 {dimension_numbers = #tpu.dot_dimension_numbers<[1], [0], [0], [1], [0, 0, 1, 1], [], []>} : vector<4x2xf32>, vector<2x256xf32>, vector<4x256xf32> -> vector<4x256xf32>
    %29 = arith.addf %25, %28 : vector<4x256xf32>
    %c0_16 = arith.constant 0 : index
    %c0_17 = arith.constant 0 : index
    %30 = vector.load %arg10[%c0_16, %c0_17] : memref<4x256xf32, #tpu.memory_space<vmem>>, vector<4x256xf32>
    tpu.vector_store %arg10[%c0_16, %c0_17], %29 {strides = array<i32>} : memref<4x256xf32, #tpu.memory_space<vmem>>, vector<4x256xf32>,
    %c0_18 = arith.constant 0 : index
    %c128 = arith.constant 128 : index
    %31 = vector.load %arg9[%c0_18, %c128] : memref<2x512xf32, #tpu.memory_space<vmem>>, vector<2x256xf32>
    tpu.vector_store %arg9[%c0_18, %c128], %24 {strides = array<i32>} : memref<2x512xf32, #tpu.memory_space<vmem>>, vector<2x256xf32>,
    %c0_19 = arith.constant 0 : index
    %c144 = arith.constant 144 : index
    %32 = vector.load %arg9[%c0_19, %c144] : memref<2x512xf32, #tpu.memory_space<vmem>>, vector<2x256xf32>
    %33 = arith.maximumf %24, %32 : vector<2x256xf32>
    %c0_20 = arith.constant 0 : index
    %c112 = arith.constant 112 : index
    %34 = vector.load %arg9[%c0_20, %c112] : memref<2x512xf32, #tpu.memory_space<vmem>>, vector<2x256xf32>
    %35 = arith.maximumf %33, %34 : vector<2x256xf32>
    %c0_21 = arith.constant 0 : index
    %c160 = arith.constant 160 : index
    %36 = vector.load %arg9[%c0_21, %c160] : memref<2x512xf32, #tpu.memory_space<vmem>>, vector<2x256xf32>
    %37 = arith.maximumf %35, %36 : vector<2x256xf32>
    %c0_22 = arith.constant 0 : index
    %c96 = arith.constant 96 : index
    %38 = vector.load %arg9[%c0_22, %c96] : memref<2x512xf32, #tpu.memory_space<vmem>>, vector<2x256xf32>
    %39 = arith.maximumf %37, %38 : vector<2x256xf32>
    %c0_23 = arith.constant 0 : index
    %c128_24 = arith.constant 128 : index
    %40 = vector.load %arg9[%c0_23, %c128_24] : memref<2x512xf32, #tpu.memory_space<vmem>>, vector<2x256xf32>
    tpu.vector_store %arg9[%c0_23, %c128_24], %39 {strides = array<i32>} : memref<2x512xf32, #tpu.memory_space<vmem>>, vector<2x256xf32>,
    %c0_25 = arith.constant 0 : index
    %c129 = arith.constant 129 : index
    %41 = vector.load %arg9[%c0_25, %c129] : memref<2x512xf32, #tpu.memory_space<vmem>>, vector<2x256xf32>
    %cst_26 = arith.constant 0xFF800000 : f32
    %42 = vector.shape_cast %5 : vector<1x256xi1> to vector<1x256xi1>
    %43 = vector.broadcast %42 : vector<1x256xi1> to vector<2x256xi1>
    %44 = vector.broadcast %cst_26 : f32 to vector<2x256xf32>
    %45 = arith.select %43, %41, %44 : vector<2x256xi1>, vector<2x256xf32>
    %46 = arith.maximumf %39, %45 : vector<2x256xf32>
    %c0_27 = arith.constant 0 : index
    %c127 = arith.constant 127 : index
    %47 = vector.load %arg9[%c0_27, %c127] : memref<2x512xf32, #tpu.memory_space<vmem>>, vector<2x256xf32>
    %cst_28 = arith.constant 0xFF800000 : f32
    %48 = vector.shape_cast %9 : vector<1x256xi1> to vector<1x256xi1>
    %49 = vector.broadcast %48 : vector<1x256xi1> to vector<2x256xi1>
    %50 = vector.broadcast %cst_28 : f32 to vector<2x256xf32>
    %51 = arith.select %49, %47, %50 : vector<2x256xi1>, vector<2x256xf32>
    %52 = arith.maximumf %46, %51 : vector<2x256xf32>
    %c0_29 = arith.constant 0 : index
    %c130 = arith.constant 130 : index
    %53 = vector.load %arg9[%c0_29, %c130] : memref<2x512xf32, #tpu.memory_space<vmem>>, vector<2x256xf32>
    %cst_30 = arith.constant 0xFF800000 : f32
    %54 = vector.shape_cast %7 : vector<1x256xi1> to vector<1x256xi1>
    %55 = vector.broadcast %54 : vector<1x256xi1> to vector<2x256xi1>
    %56 = vector.broadcast %cst_30 : f32 to vector<2x256xf32>
    %57 = arith.select %55, %53, %56 : vector<2x256xi1>, vector<2x256xf32>
    %58 = arith.maximumf %52, %57 : vector<2x256xf32>
    %c0_31 = arith.constant 0 : index
    %c126 = arith.constant 126 : index
    %59 = vector.load %arg9[%c0_31, %c126] : memref<2x512xf32, #tpu.memory_space<vmem>>, vector<2x256xf32>
    %cst_32 = arith.constant 0xFF800000 : f32
    %60 = vector.shape_cast %11 : vector<1x256xi1> to vector<1x256xi1>
    %61 = vector.broadcast %60 : vector<1x256xi1> to vector<2x256xi1>
    %62 = vector.broadcast %cst_32 : f32 to vector<2x256xf32>
    %63 = arith.select %61, %59, %62 : vector<2x256xi1>, vector<2x256xf32>
    %64 = arith.maximumf %58, %63 : vector<2x256xf32>
    %c0_33 = arith.constant 0 : index
    %c0_34 = arith.constant 0 : index
    %65 = vector.load %arg10[%c0_33, %c0_34] : memref<4x256xf32, #tpu.memory_space<vmem>>, vector<4x256xf32>
    %c1 = arith.constant 1 : index
    %c0_35 = arith.constant 0 : index
    %c0_36 = arith.constant 0 : index
    %66 = vector.load %arg6[%c1, %c0_35, %c0_36] : memref<4x4x2xf32, #tpu.memory_space<vmem>>, vector<1x4x2xf32>
    %67 = vector.shape_cast %66 : vector<1x4x2xf32> to vector<4x2xf32>
    %cst_37 = arith.constant dense<0.000000e+00> : vector<4x256xf32>
    %68 = tpu.matmul %67, %64, %cst_37 {dimension_numbers = #tpu.dot_dimension_numbers<[1], [0], [0], [1], [0, 0, 1, 1], [], []>} : vector<4x2xf32>, vector<2x256xf32>, vector<4x256xf32> -> vector<4x256xf32>
    %69 = arith.addf %65, %68 : vector<4x256xf32>
    %c0_38 = arith.constant 0 : index
    %c0_39 = arith.constant 0 : index
    %70 = vector.load %arg10[%c0_38, %c0_39] : memref<4x256xf32, #tpu.memory_space<vmem>>, vector<4x256xf32>
    tpu.vector_store %arg10[%c0_38, %c0_39], %69 {strides = array<i32>} : memref<4x256xf32, #tpu.memory_space<vmem>>, vector<4x256xf32>,
    %c0_40 = arith.constant 0 : index
    %c128_41 = arith.constant 128 : index
    %71 = vector.load %arg9[%c0_40, %c128_41] : memref<2x512xf32, #tpu.memory_space<vmem>>, vector<2x256xf32>
    tpu.vector_store %arg9[%c0_40, %c128_41], %64 {strides = array<i32>} : memref<2x512xf32, #tpu.memory_space<vmem>>, vector<2x256xf32>,
    %c0_42 = arith.constant 0 : index
    %c144_43 = arith.constant 144 : index
    %72 = vector.load %arg9[%c0_42, %c144_43] : memref<2x512xf32, #tpu.memory_space<vmem>>, vector<2x256xf32>
    %73 = arith.maximumf %64, %72 : vector<2x256xf32>
    %c0_44 = arith.constant 0 : index
    %c112_45 = arith.constant 112 : index
    %74 = vector.load %arg9[%c0_44, %c112_45] : memref<2x512xf32, #tpu.memory_space<vmem>>, vector<2x256xf32>
    %75 = arith.maximumf %73, %74 : vector<2x256xf32>
    %c0_46 = arith.constant 0 : index
    %c160_47 = arith.constant 160 : index
    %76 = vector.load %arg9[%c0_46, %c160_47] : memref<2x512xf32, #tpu.memory_space<vmem>>, vector<2x256xf32>
    %77 = arith.maximumf %75, %76 : vector<2x256xf32>
    %c0_48 = arith.constant 0 : index
    %c96_49 = arith.constant 96 : index
    %78 = vector.load %arg9[%c0_48, %c96_49] : memref<2x512xf32, #tpu.memory_space<vmem>>, vector<2x256xf32>
    %79 = arith.maximumf %77, %78 : vector<2x256xf32>
    %c0_50 = arith.constant 0 : index
    %c128_51 = arith.constant 128 : index
    %80 = vector.load %arg9[%c0_50, %c128_51] : memref<2x512xf32, #tpu.memory_space<vmem>>, vector<2x256xf32>
    tpu.vector_store %arg9[%c0_50, %c128_51], %79 {strides = array<i32>} : memref<2x512xf32, #tpu.memory_space<vmem>>, vector<2x256xf32>,
    %c0_52 = arith.constant 0 : index
    %c129_53 = arith.constant 129 : index
    %81 = vector.load %arg9[%c0_52, %c129_53] : memref<2x512xf32, #tpu.memory_space<vmem>>, vector<2x256xf32>
    %cst_54 = arith.constant 0xFF800000 : f32
    %82 = vector.shape_cast %5 : vector<1x256xi1> to vector<1x256xi1>
    %83 = vector.broadcast %82 : vector<1x256xi1> to vector<2x256xi1>
    %84 = vector.broadcast %cst_54 : f32 to vector<2x256xf32>
    %85 = arith.select %83, %81, %84 : vector<2x256xi1>, vector<2x256xf32>
    %86 = arith.maximumf %79, %85 : vector<2x256xf32>
    %c0_55 = arith.constant 0 : index
    %c127_56 = arith.constant 127 : index
    %87 = vector.load %arg9[%c0_55, %c127_56] : memref<2x512xf32, #tpu.memory_space<vmem>>, vector<2x256xf32>
    %cst_57 = arith.constant 0xFF800000 : f32
    %88 = vector.shape_cast %9 : vector<1x256xi1> to vector<1x256xi1>
    %89 = vector.broadcast %88 : vector<1x256xi1> to vector<2x256xi1>
    %90 = vector.broadcast %cst_57 : f32 to vector<2x256xf32>
    %91 = arith.select %89, %87, %90 : vector<2x256xi1>, vector<2x256xf32>
    %92 = arith.maximumf %86, %91 : vector<2x256xf32>
    %c0_58 = arith.constant 0 : index
    %c130_59 = arith.constant 130 : index
    %93 = vector.load %arg9[%c0_58, %c130_59] : memref<2x512xf32, #tpu.memory_space<vmem>>, vector<2x256xf32>
    %cst_60 = arith.constant 0xFF800000 : f32
    %94 = vector.shape_cast %7 : vector<1x256xi1> to vector<1x256xi1>
    %95 = vector.broadcast %94 : vector<1x256xi1> to vector<2x256xi1>
    %96 = vector.broadcast %cst_60 : f32 to vector<2x256xf32>
    %97 = arith.select %95, %93, %96 : vector<2x256xi1>, vector<2x256xf32>
    %98 = arith.maximumf %92, %97 : vector<2x256xf32>
    %c0_61 = arith.constant 0 : index
    %c126_62 = arith.constant 126 : index
    %99 = vector.load %arg9[%c0_61, %c126_62] : memref<2x512xf32, #tpu.memory_space<vmem>>, vector<2x256xf32>
    %cst_63 = arith.constant 0xFF800000 : f32
    %100 = vector.shape_cast %11 : vector<1x256xi1> to vector<1x256xi1>
    %101 = vector.broadcast %100 : vector<1x256xi1> to vector<2x256xi1>
    %102 = vector.broadcast %cst_63 : f32 to vector<2x256xf32>
    %103 = arith.select %101, %99, %102 : vector<2x256xi1>, vector<2x256xf32>
    %104 = arith.maximumf %98, %103 : vector<2x256xf32>
    %c0_64 = arith.constant 0 : index
    %c0_65 = arith.constant 0 : index
    %105 = vector.load %arg10[%c0_64, %c0_65] : memref<4x256xf32, #tpu.memory_space<vmem>>, vector<4x256xf32>
    %c2 = arith.constant 2 : index
    %c0_66 = arith.constant 0 : index
    %c0_67 = arith.constant 0 : index
    %106 = vector.load %arg6[%c2, %c0_66, %c0_67] : memref<4x4x2xf32, #tpu.memory_space<vmem>>, vector<1x4x2xf32>
    %107 = vector.shape_cast %106 : vector<1x4x2xf32> to vector<4x2xf32>
    %cst_68 = arith.constant dense<0.000000e+00> : vector<4x256xf32>
    %108 = tpu.matmul %107, %104, %cst_68 {dimension_numbers = #tpu.dot_dimension_numbers<[1], [0], [0], [1], [0, 0, 1, 1], [], []>} : vector<4x2xf32>, vector<2x256xf32>, vector<4x256xf32> -> vector<4x256xf32>
    %109 = arith.addf %105, %108 : vector<4x256xf32>
    %c0_69 = arith.constant 0 : index
    %c0_70 = arith.constant 0 : index
    %110 = vector.load %arg10[%c0_69, %c0_70] : memref<4x256xf32, #tpu.memory_space<vmem>>, vector<4x256xf32>
    tpu.vector_store %arg10[%c0_69, %c0_70], %109 {strides = array<i32>} : memref<4x256xf32, #tpu.memory_space<vmem>>, vector<4x256xf32>,
    %c0_71 = arith.constant 0 : index
    %c128_72 = arith.constant 128 : index
    %111 = vector.load %arg9[%c0_71, %c128_72] : memref<2x512xf32, #tpu.memory_space<vmem>>, vector<2x256xf32>
    tpu.vector_store %arg9[%c0_71, %c128_72], %104 {strides = array<i32>} : memref<2x512xf32, #tpu.memory_space<vmem>>, vector<2x256xf32>,
    %c0_73 = arith.constant 0 : index
    %c144_74 = arith.constant 144 : index
    %112 = vector.load %arg9[%c0_73, %c144_74] : memref<2x512xf32, #tpu.memory_space<vmem>>, vector<2x256xf32>
    %113 = arith.maximumf %104, %112 : vector<2x256xf32>
    %c0_75 = arith.constant 0 : index
    %c112_76 = arith.constant 112 : index
    %114 = vector.load %arg9[%c0_75, %c112_76] : memref<2x512xf32, #tpu.memory_space<vmem>>, vector<2x256xf32>
    %115 = arith.maximumf %113, %114 : vector<2x256xf32>
    %c0_77 = arith.constant 0 : index
    %c160_78 = arith.constant 160 : index
    %116 = vector.load %arg9[%c0_77, %c160_78] : memref<2x512xf32, #tpu.memory_space<vmem>>, vector<2x256xf32>
    %117 = arith.maximumf %115, %116 : vector<2x256xf32>
    %c0_79 = arith.constant 0 : index
    %c96_80 = arith.constant 96 : index
    %118 = vector.load %arg9[%c0_79, %c96_80] : memref<2x512xf32, #tpu.memory_space<vmem>>, vector<2x256xf32>
    %119 = arith.maximumf %117, %118 : vector<2x256xf32>
    %c0_81 = arith.constant 0 : index
    %c128_82 = arith.constant 128 : index
    %120 = vector.load %arg9[%c0_81, %c128_82] : memref<2x512xf32, #tpu.memory_space<vmem>>, vector<2x256xf32>
    tpu.vector_store %arg9[%c0_81, %c128_82], %119 {strides = array<i32>} : memref<2x512xf32, #tpu.memory_space<vmem>>, vector<2x256xf32>,
    %c0_83 = arith.constant 0 : index
    %c129_84 = arith.constant 129 : index
    %121 = vector.load %arg9[%c0_83, %c129_84] : memref<2x512xf32, #tpu.memory_space<vmem>>, vector<2x256xf32>
    %cst_85 = arith.constant 0xFF800000 : f32
    %122 = vector.shape_cast %5 : vector<1x256xi1> to vector<1x256xi1>
    %123 = vector.broadcast %122 : vector<1x256xi1> to vector<2x256xi1>
    %124 = vector.broadcast %cst_85 : f32 to vector<2x256xf32>
    %125 = arith.select %123, %121, %124 : vector<2x256xi1>, vector<2x256xf32>
    %126 = arith.maximumf %119, %125 : vector<2x256xf32>
    %c0_86 = arith.constant 0 : index
    %c127_87 = arith.constant 127 : index
    %127 = vector.load %arg9[%c0_86, %c127_87] : memref<2x512xf32, #tpu.memory_space<vmem>>, vector<2x256xf32>
    %cst_88 = arith.constant 0xFF800000 : f32
    %128 = vector.shape_cast %9 : vector<1x256xi1> to vector<1x256xi1>
    %129 = vector.broadcast %128 : vector<1x256xi1> to vector<2x256xi1>
    %130 = vector.broadcast %cst_88 : f32 to vector<2x256xf32>
    %131 = arith.select %129, %127, %130 : vector<2x256xi1>, vector<2x256xf32>
    %132 = arith.maximumf %126, %131 : vector<2x256xf32>
    %c0_89 = arith.constant 0 : index
    %c130_90 = arith.constant 130 : index
    %133 = vector.load %arg9[%c0_89, %c130_90] : memref<2x512xf32, #tpu.memory_space<vmem>>, vector<2x256xf32>
    %cst_91 = arith.constant 0xFF800000 : f32
    %134 = vector.shape_cast %7 : vector<1x256xi1> to vector<1x256xi1>
    %135 = vector.broadcast %134 : vector<1x256xi1> to vector<2x256xi1>
    %136 = vector.broadcast %cst_91 : f32 to vector<2x256xf32>
    %137 = arith.select %135, %133, %136 : vector<2x256xi1>, vector<2x256xf32>
    %138 = arith.maximumf %132, %137 : vector<2x256xf32>
    %c0_92 = arith.constant 0 : index
    %c126_93 = arith.constant 126 : index
    %139 = vector.load %arg9[%c0_92, %c126_93] : memref<2x512xf32, #tpu.memory_space<vmem>>, vector<2x256xf32>
    %cst_94 = arith.constant 0xFF800000 : f32
    %140 = vector.shape_cast %11 : vector<1x256xi1> to vector<1x256xi1>
    %141 = vector.broadcast %140 : vector<1x256xi1> to vector<2x256xi1>
    %142 = vector.broadcast %cst_94 : f32 to vector<2x256xf32>
    %143 = arith.select %141, %139, %142 : vector<2x256xi1>, vector<2x256xf32>
    %144 = arith.maximumf %138, %143 : vector<2x256xf32>
    %c0_95 = arith.constant 0 : index
    %c0_96 = arith.constant 0 : index
    %145 = vector.load %arg10[%c0_95, %c0_96] : memref<4x256xf32, #tpu.memory_space<vmem>>, vector<4x256xf32>
    %c3 = arith.constant 3 : index
    %c0_97 = arith.constant 0 : index
    %c0_98 = arith.constant 0 : index
    %146 = vector.load %arg6[%c3, %c0_97, %c0_98] : memref<4x4x2xf32, #tpu.memory_space<vmem>>, vector<1x4x2xf32>
    %147 = vector.shape_cast %146 : vector<1x4x2xf32> to vector<4x2xf32>
    %cst_99 = arith.constant dense<0.000000e+00> : vector<4x256xf32>
    %148 = tpu.matmul %147, %144, %cst_99 {dimension_numbers = #tpu.dot_dimension_numbers<[1], [0], [0], [1], [0, 0, 1, 1], [], []>} : vector<4x2xf32>, vector<2x256xf32>, vector<4x256xf32> -> vector<4x256xf32>
    %149 = arith.addf %145, %148 : vector<4x256xf32>
    %c0_100 = arith.constant 0 : index
    %c0_101 = arith.constant 0 : index
    %150 = vector.load %arg10[%c0_100, %c0_101] : memref<4x256xf32, #tpu.memory_space<vmem>>, vector<4x256xf32>
    tpu.vector_store %arg10[%c0_100, %c0_101], %149 {strides = array<i32>} : memref<4x256xf32, #tpu.memory_space<vmem>>, vector<4x256xf32>,
    %c0_i32_102 = arith.constant 0 : i32
    %151 = arith.cmpi eq, %arg1, %c0_i32_102 : i32
    %152 = arith.extui %151 : i1 to i32
    %c0_i32_103 = arith.constant 0 : i32
    %153 = arith.cmpi ne, %152, %c0_i32_103 : i32
    scf.if %153 {
      %c0_104 = arith.constant 0 : index
      %c0_105 = arith.constant 0 : index
      %154 = vector.load %arg10[%c0_104, %c0_105] : memref<4x256xf32, #tpu.memory_space<vmem>>, vector<4x256xf32>
      %c0_106 = arith.constant 0 : index
      %c0_107 = arith.constant 0 : index
      %155 = vector.load %arg7[%c0_106, %c0_107] : memref<4x1xf32, #tpu.memory_space<vmem>>, vector<4x1xf32>
      %156 = vector.broadcast %155 : vector<4x1xf32> to vector<4x256xf32>
      %157 = arith.addf %154, %156 : vector<4x256xf32>
      %158 = arith.negf %157 : vector<4x256xf32>
      %159 = math.exp %158 : vector<4x256xf32>
      %cst_108 = arith.constant 1.000000e+00 : f32
      %160 = vector.broadcast %cst_108 : f32 to vector<4x256xf32>
      %161 = arith.addf %160, %159 : vector<4x256xf32>
      %162 = arith.divf %160, %161 : vector<4x256xf32>
      %163 = arith.mulf %157, %162 : vector<4x256xf32>
      %c0_109 = arith.constant 0 : index
      %c0_110 = arith.constant 0 : index
      %c0_111 = arith.constant 0 : index
      %164 = vector.load %arg8[%c0_109, %c0_110, %c0_111] : memref<1x4x256xf32, #tpu.memory_space<vmem>>, vector<1x4x256xf32>
      %165 = vector.shape_cast %164 : vector<1x4x256xf32> to vector<4x256xf32>
      %166 = vector.shape_cast %163 : vector<4x256xf32> to vector<1x4x256xf32>
      tpu.vector_store %arg8[%c0_109, %c0_110, %c0_111], %166 {strides = array<i32>} : memref<1x4x256xf32, #tpu.memory_space<vmem>>, vector<1x4x256xf32>,
    } else {
    }
    return
  }
  func.func @transform_0(%arg0: i32, %arg1: i32) -> (i32, i32) {
    %c0_i32 = arith.constant 0 : i32
    %c0_i32_0 = arith.constant 0 : i32
    %c0_i32_1 = arith.constant 0 : i32
    return %c0_i32, %c0_i32_0 : i32, i32
  }
  func.func @transform_1(%arg0: i32, %arg1: i32) -> (i32, i32, i32) {
    %c0_i32 = arith.constant 0 : i32
    %c0_i32_0 = arith.constant 0 : i32
    %c0_i32_1 = arith.constant 0 : i32
    return %arg0, %c0_i32, %c0_i32_0 : i32, i32, i32
  }
  func.func @transform_2(%arg0: i32, %arg1: i32) -> (i32, i32) {
    %c0_i32 = arith.constant 0 : i32
    %c0_i32_0 = arith.constant 0 : i32
    return %arg1, %c0_i32 : i32, i32
  }
  func.func @transform_3(%arg0: i32, %arg1: i32) -> (i32, i32) {
    %c0_i32 = arith.constant 0 : i32
    %c0_i32_0 = arith.constant 0 : i32
    return %arg1, %c0_i32 : i32, i32
  }
  func.func @transform_4(%arg0: i32, %arg1: i32) -> (i32, i32, i32) {
    %c0_i32 = arith.constant 0 : i32
    %c0_i32_0 = arith.constant 0 : i32
    %c0_i32_1 = arith.constant 0 : i32
    return %c0_i32, %c0_i32_0, %arg1 : i32, i32, i32
  }
  func.func @transform_5(%arg0: i32, %arg1: i32) -> (i32, i32) {
    %c0_i32 = arith.constant 0 : i32
    %c0_i32_0 = arith.constant 0 : i32
    %c0_i32_1 = arith.constant 0 : i32
    return %c0_i32, %c0_i32_0 : i32, i32
  }
  func.func @transform_6(%arg0: i32, %arg1: i32) -> (i32, i32, i32) {
    %c0_i32 = arith.constant 0 : i32
    %c0_i32_0 = arith.constant 0 : i32
    %c0_i32_1 = arith.constant 0 : i32
    return %arg0, %c0_i32, %c0_i32_0 : i32, i32, i32
  }
}

module attributes {stable_mosaic.version = 11 : i64} {
  func.func @_spp_fused_kernel(%arg0: i32, %arg1: i32, %arg2: memref<1x256xi32, #tpu.memory_space<vmem>>, %arg3: memref<1x4x256xf32, #tpu.memory_space<vmem>>, %arg4: memref<2x4xf32, #tpu.memory_space<vmem>>, %arg5: memref<2x1xf32, #tpu.memory_space<vmem>>, %arg6: memref<4x4x2xf32, #tpu.memory_space<vmem>>, %arg7: memref<4x1xf32, #tpu.memory_space<vmem>>, %arg8: memref<1x4x256xf32, #tpu.memory_space<vmem>>, %arg9: memref<2x512xf32, #tpu.memory_space<vmem>>, %arg10: memref<4x256xf32, #tpu.memory_space<vmem>>) attributes {dimension_semantics = [#tpu.dimension_semantics<parallel>, #tpu.dimension_semantics<arbitrary>], iteration_bounds = array<i64: 2, 1>, scalar_prefetch = 0 : i64, scratch_operands = 2 : i64, tpu.core_type = #tpu.core_type<tc>, window_params = [{pipeline_mode = #tpu.pipeline_mode<synchronous>, transform_indices = @transform_0, window_bounds = array<i64: 1, 256>}, {transform_indices = @transform_1, window_bounds = array<i64: 1, 4, 256>}, {transform_indices = @transform_2, window_bounds = array<i64: 2, 4>}, {transform_indices = @transform_3, window_bounds = array<i64: 2, 1>}, {transform_indices = @transform_4, window_bounds = array<i64: 4, 4, 2>}, {pipeline_mode = #tpu.pipeline_mode<synchronous>, transform_indices = @transform_5, window_bounds = array<i64: 4, 1>}, {transform_indices = @transform_6, window_bounds = array<i64: 1, 4, 256>}]} {
    %c0_i32 = arith.constant 0 : i32
    %0 = arith.cmpi eq, %arg1, %c0_i32 : i32
    %1 = arith.extui %0 : i1 to i32
    %c0_i32_0 = arith.constant 0 : i32
    %2 = arith.cmpi ne, %1, %c0_i32_0 : i32
    scf.if %2 {
      %cst_104 = arith.constant 0xFF800000 : f32
      %154 = vector.broadcast %cst_104 : f32 to vector<2x128xf32>
      %c0_105 = arith.constant 0 : index
      %c0_106 = arith.constant 0 : index
      %155 = vector.load %arg9[%c0_105, %c0_106] : memref<2x512xf32, #tpu.memory_space<vmem>>, vector<2x128xf32>
      tpu.vector_store %arg9[%c0_105, %c0_106], %154 {strides = array<i32>} : memref<2x512xf32, #tpu.memory_space<vmem>>, vector<2x128xf32>,
      %cst_107 = arith.constant 0xFF800000 : f32
      %156 = vector.broadcast %cst_107 : f32 to vector<2x128xf32>
      %c0_108 = arith.constant 0 : index
      %c384 = arith.constant 384 : index
      %157 = vector.load %arg9[%c0_108, %c384] : memref<2x512xf32, #tpu.memory_space<vmem>>, vector<2x128xf32>
      tpu.vector_store %arg9[%c0_108, %c384], %156 {strides = array<i32>} : memref<2x512xf32, #tpu.memory_space<vmem>>, vector<2x128xf32>,
      %cst_109 = arith.constant 0.000000e+00 : f32
      %158 = vector.broadcast %cst_109 : f32 to vector<4x256xf32>
      %c0_110 = arith.constant 0 : index
      %c0_111 = arith.constant 0 : index
      %159 = vector.load %arg10[%c0_110, %c0_111] : memref<4x256xf32, #tpu.memory_space<vmem>>, vector<4x256xf32>
      tpu.vector_store %arg10[%c0_110, %c0_111], %158 {strides = array<i32>} : memref<4x256xf32, #tpu.memory_space<vmem>>, vector<4x256xf32>,
    } else {
    }
    %c0 = arith.constant 0 : index
    %c0_1 = arith.constant 0 : index
    %3 = vector.load %arg2[%c0, %c0_1] : memref<1x256xi32, #tpu.memory_space<vmem>>, vector<1x256xi32>
    %c15_i32 = arith.constant 15 : i32
    %4 = vector.broadcast %c15_i32 : i32 to vector<1x256xi32>
    %5 = arith.cmpi slt, %3, %4 : vector<1x256xi32>
    %c14_i32 = arith.constant 14 : i32
    %6 = vector.broadcast %c14_i32 : i32 to vector<1x256xi32>
    %7 = arith.cmpi slt, %3, %6 : vector<1x256xi32>
    %c1_i32 = arith.constant 1 : i32
    %8 = vector.broadcast %c1_i32 : i32 to vector<1x256xi32>
    %9 = arith.cmpi sge, %3, %8 : vector<1x256xi32>
    %c2_i32 = arith.constant 2 : i32
    %10 = vector.broadcast %c2_i32 : i32 to vector<1x256xi32>
    %11 = arith.cmpi sge, %3, %10 : vector<1x256xi32>
    %c0_2 = arith.constant 0 : index
    %c0_3 = arith.constant 0 : index
    %12 = vector.load %arg4[%c0_2, %c0_3] : memref<2x4xf32, #tpu.memory_space<vmem>>, vector<2x4xf32>
    %c0_4 = arith.constant 0 : index
    %c0_5 = arith.constant 0 : index
    %c0_6 = arith.constant 0 : index
    %13 = vector.load %arg3[%c0_4, %c0_5, %c0_6] : memref<1x4x256xf32, #tpu.memory_space<vmem>>, vector<1x4x256xf32>
    %14 = vector.shape_cast %13 : vector<1x4x256xf32> to vector<4x256xf32>
    %cst = arith.constant dense<0.000000e+00> : vector<2x256xf32>
    %15 = tpu.matmul %12, %14, %cst {dimension_numbers = #tpu.dot_dimension_numbers<[1], [0], [0], [1], [0, 0, 1, 1], [], []>} : vector<2x4xf32>, vector<4x256xf32>, vector<2x256xf32> -> vector<2x256xf32>
    %c0_7 = arith.constant 0 : index
    %c0_8 = arith.constant 0 : index
    %16 = vector.load %arg5[%c0_7, %c0_8] : memref<2x1xf32, #tpu.memory_space<vmem>>, vector<2x1xf32>
    %17 = vector.broadcast %16 : vector<2x1xf32> to vector<2x256xf32>
    %18 = arith.addf %15, %17 : vector<2x256xf32>
    %19 = arith.negf %18 : vector<2x256xf32>
    %20 = math.exp %19 : vector<2x256xf32>
    %cst_9 = arith.constant 1.000000e+00 : f32
    %21 = vector.broadcast %cst_9 : f32 to vector<2x256xf32>
    %22 = arith.addf %21, %20 : vector<2x256xf32>
    %23 = arith.divf %21, %22 : vector<2x256xf32>
    %24 = arith.mulf %18, %23 : vector<2x256xf32>
    %c0_10 = arith.constant 0 : index
    %c0_11 = arith.constant 0 : index
    %25 = vector.load %arg10[%c0_10, %c0_11] : memref<4x256xf32, #tpu.memory_space<vmem>>, vector<4x256xf32>
    %c0_12 = arith.constant 0 : index
    %c0_13 = arith.constant 0 : index
    %c0_14 = arith.constant 0 : index
    %26 = vector.load %arg6[%c0_12, %c0_13, %c0_14] : memref<4x4x2xf32, #tpu.memory_space<vmem>>, vector<1x4x2xf32>
    %27 = vector.shape_cast %26 : vector<1x4x2xf32> to vector<4x2xf32>
    %cst_15 = arith.constant dense<0.000000e+00> : vector<4x256xf32>
    %28 = tpu.matmul %27, %24, %cst_15 {dimension_numbers = #tpu.dot_dimension_numbers<[1], [0], [0], [1], [0, 0, 1, 1], [], []>} : vector<4x2xf32>, vector<2x256xf32>, vector<4x256xf32> -> vector<4x256xf32>
    %29 = arith.addf %25, %28 : vector<4x256xf32>
    %c0_16 = arith.constant 0 : index
    %c0_17 = arith.constant 0 : index
    %30 = vector.load %arg10[%c0_16, %c0_17] : memref<4x256xf32, #tpu.memory_space<vmem>>, vector<4x256xf32>
    tpu.vector_store %arg10[%c0_16, %c0_17], %29 {strides = array<i32>} : memref<4x256xf32, #tpu.memory_space<vmem>>, vector<4x256xf32>,
    %c0_18 = arith.constant 0 : index
    %c128 = arith.constant 128 : index
    %31 = vector.load %arg9[%c0_18, %c128] : memref<2x512xf32, #tpu.memory_space<vmem>>, vector<2x256xf32>
    tpu.vector_store %arg9[%c0_18, %c128], %24 {strides = array<i32>} : memref<2x512xf32, #tpu.memory_space<vmem>>, vector<2x256xf32>,
    %c0_19 = arith.constant 0 : index
    %c144 = arith.constant 144 : index
    %32 = vector.load %arg9[%c0_19, %c144] : memref<2x512xf32, #tpu.memory_space<vmem>>, vector<2x256xf32>
    %33 = arith.maximumf %24, %32 : vector<2x256xf32>
    %c0_20 = arith.constant 0 : index
    %c112 = arith.constant 112 : index
    %34 = vector.load %arg9[%c0_20, %c112] : memref<2x512xf32, #tpu.memory_space<vmem>>, vector<2x256xf32>
    %35 = arith.maximumf %33, %34 : vector<2x256xf32>
    %c0_21 = arith.constant 0 : index
    %c160 = arith.constant 160 : index
    %36 = vector.load %arg9[%c0_21, %c160] : memref<2x512xf32, #tpu.memory_space<vmem>>, vector<2x256xf32>
    %37 = arith.maximumf %35, %36 : vector<2x256xf32>
    %c0_22 = arith.constant 0 : index
    %c96 = arith.constant 96 : index
    %38 = vector.load %arg9[%c0_22, %c96] : memref<2x512xf32, #tpu.memory_space<vmem>>, vector<2x256xf32>
    %39 = arith.maximumf %37, %38 : vector<2x256xf32>
    %c0_23 = arith.constant 0 : index
    %c128_24 = arith.constant 128 : index
    %40 = vector.load %arg9[%c0_23, %c128_24] : memref<2x512xf32, #tpu.memory_space<vmem>>, vector<2x256xf32>
    tpu.vector_store %arg9[%c0_23, %c128_24], %39 {strides = array<i32>} : memref<2x512xf32, #tpu.memory_space<vmem>>, vector<2x256xf32>,
    %c0_25 = arith.constant 0 : index
    %c129 = arith.constant 129 : index
    %41 = vector.load %arg9[%c0_25, %c129] : memref<2x512xf32, #tpu.memory_space<vmem>>, vector<2x256xf32>
    %cst_26 = arith.constant 0xFF800000 : f32
    %42 = vector.shape_cast %5 : vector<1x256xi1> to vector<1x256xi1>
    %43 = vector.broadcast %42 : vector<1x256xi1> to vector<2x256xi1>
    %44 = vector.broadcast %cst_26 : f32 to vector<2x256xf32>
    %45 = arith.select %43, %41, %44 : vector<2x256xi1>, vector<2x256xf32>
    %46 = arith.maximumf %39, %45 : vector<2x256xf32>
    %c0_27 = arith.constant 0 : index
    %c127 = arith.constant 127 : index
    %47 = vector.load %arg9[%c0_27, %c127] : memref<2x512xf32, #tpu.memory_space<vmem>>, vector<2x256xf32>
    %cst_28 = arith.constant 0xFF800000 : f32
    %48 = vector.shape_cast %9 : vector<1x256xi1> to vector<1x256xi1>
    %49 = vector.broadcast %48 : vector<1x256xi1> to vector<2x256xi1>
    %50 = vector.broadcast %cst_28 : f32 to vector<2x256xf32>
    %51 = arith.select %49, %47, %50 : vector<2x256xi1>, vector<2x256xf32>
    %52 = arith.maximumf %46, %51 : vector<2x256xf32>
    %c0_29 = arith.constant 0 : index
    %c130 = arith.constant 130 : index
    %53 = vector.load %arg9[%c0_29, %c130] : memref<2x512xf32, #tpu.memory_space<vmem>>, vector<2x256xf32>
    %cst_30 = arith.constant 0xFF800000 : f32
    %54 = vector.shape_cast %7 : vector<1x256xi1> to vector<1x256xi1>
    %55 = vector.broadcast %54 : vector<1x256xi1> to vector<2x256xi1>
    %56 = vector.broadcast %cst_30 : f32 to vector<2x256xf32>
    %57 = arith.select %55, %53, %56 : vector<2x256xi1>, vector<2x256xf32>
    %58 = arith.maximumf %52, %57 : vector<2x256xf32>
    %c0_31 = arith.constant 0 : index
    %c126 = arith.constant 126 : index
    %59 = vector.load %arg9[%c0_31, %c126] : memref<2x512xf32, #tpu.memory_space<vmem>>, vector<2x256xf32>
    %cst_32 = arith.constant 0xFF800000 : f32
    %60 = vector.shape_cast %11 : vector<1x256xi1> to vector<1x256xi1>
    %61 = vector.broadcast %60 : vector<1x256xi1> to vector<2x256xi1>
    %62 = vector.broadcast %cst_32 : f32 to vector<2x256xf32>
    %63 = arith.select %61, %59, %62 : vector<2x256xi1>, vector<2x256xf32>
    %64 = arith.maximumf %58, %63 : vector<2x256xf32>
    %c0_33 = arith.constant 0 : index
    %c0_34 = arith.constant 0 : index
    %65 = vector.load %arg10[%c0_33, %c0_34] : memref<4x256xf32, #tpu.memory_space<vmem>>, vector<4x256xf32>
    %c1 = arith.constant 1 : index
    %c0_35 = arith.constant 0 : index
    %c0_36 = arith.constant 0 : index
    %66 = vector.load %arg6[%c1, %c0_35, %c0_36] : memref<4x4x2xf32, #tpu.memory_space<vmem>>, vector<1x4x2xf32>
    %67 = vector.shape_cast %66 : vector<1x4x2xf32> to vector<4x2xf32>
    %cst_37 = arith.constant dense<0.000000e+00> : vector<4x256xf32>
    %68 = tpu.matmul %67, %64, %cst_37 {dimension_numbers = #tpu.dot_dimension_numbers<[1], [0], [0], [1], [0, 0, 1, 1], [], []>} : vector<4x2xf32>, vector<2x256xf32>, vector<4x256xf32> -> vector<4x256xf32>
    %69 = arith.addf %65, %68 : vector<4x256xf32>
    %c0_38 = arith.constant 0 : index
    %c0_39 = arith.constant 0 : index
    %70 = vector.load %arg10[%c0_38, %c0_39] : memref<4x256xf32, #tpu.memory_space<vmem>>, vector<4x256xf32>
    tpu.vector_store %arg10[%c0_38, %c0_39], %69 {strides = array<i32>} : memref<4x256xf32, #tpu.memory_space<vmem>>, vector<4x256xf32>,
    %c0_40 = arith.constant 0 : index
    %c128_41 = arith.constant 128 : index
    %71 = vector.load %arg9[%c0_40, %c128_41] : memref<2x512xf32, #tpu.memory_space<vmem>>, vector<2x256xf32>
    tpu.vector_store %arg9[%c0_40, %c128_41], %64 {strides = array<i32>} : memref<2x512xf32, #tpu.memory_space<vmem>>, vector<2x256xf32>,
    %c0_42 = arith.constant 0 : index
    %c144_43 = arith.constant 144 : index
    %72 = vector.load %arg9[%c0_42, %c144_43] : memref<2x512xf32, #tpu.memory_space<vmem>>, vector<2x256xf32>
    %73 = arith.maximumf %64, %72 : vector<2x256xf32>
    %c0_44 = arith.constant 0 : index
    %c112_45 = arith.constant 112 : index
    %74 = vector.load %arg9[%c0_44, %c112_45] : memref<2x512xf32, #tpu.memory_space<vmem>>, vector<2x256xf32>
    %75 = arith.maximumf %73, %74 : vector<2x256xf32>
    %c0_46 = arith.constant 0 : index
    %c160_47 = arith.constant 160 : index
    %76 = vector.load %arg9[%c0_46, %c160_47] : memref<2x512xf32, #tpu.memory_space<vmem>>, vector<2x256xf32>
    %77 = arith.maximumf %75, %76 : vector<2x256xf32>
    %c0_48 = arith.constant 0 : index
    %c96_49 = arith.constant 96 : index
    %78 = vector.load %arg9[%c0_48, %c96_49] : memref<2x512xf32, #tpu.memory_space<vmem>>, vector<2x256xf32>
    %79 = arith.maximumf %77, %78 : vector<2x256xf32>
    %c0_50 = arith.constant 0 : index
    %c128_51 = arith.constant 128 : index
    %80 = vector.load %arg9[%c0_50, %c128_51] : memref<2x512xf32, #tpu.memory_space<vmem>>, vector<2x256xf32>
    tpu.vector_store %arg9[%c0_50, %c128_51], %79 {strides = array<i32>} : memref<2x512xf32, #tpu.memory_space<vmem>>, vector<2x256xf32>,
    %c0_52 = arith.constant 0 : index
    %c129_53 = arith.constant 129 : index
    %81 = vector.load %arg9[%c0_52, %c129_53] : memref<2x512xf32, #tpu.memory_space<vmem>>, vector<2x256xf32>
    %cst_54 = arith.constant 0xFF800000 : f32
    %82 = vector.shape_cast %5 : vector<1x256xi1> to vector<1x256xi1>
    %83 = vector.broadcast %82 : vector<1x256xi1> to vector<2x256xi1>
    %84 = vector.broadcast %cst_54 : f32 to vector<2x256xf32>
    %85 = arith.select %83, %81, %84 : vector<2x256xi1>, vector<2x256xf32>
    %86 = arith.maximumf %79, %85 : vector<2x256xf32>
    %c0_55 = arith.constant 0 : index
    %c127_56 = arith.constant 127 : index
    %87 = vector.load %arg9[%c0_55, %c127_56] : memref<2x512xf32, #tpu.memory_space<vmem>>, vector<2x256xf32>
    %cst_57 = arith.constant 0xFF800000 : f32
    %88 = vector.shape_cast %9 : vector<1x256xi1> to vector<1x256xi1>
    %89 = vector.broadcast %88 : vector<1x256xi1> to vector<2x256xi1>
    %90 = vector.broadcast %cst_57 : f32 to vector<2x256xf32>
    %91 = arith.select %89, %87, %90 : vector<2x256xi1>, vector<2x256xf32>
    %92 = arith.maximumf %86, %91 : vector<2x256xf32>
    %c0_58 = arith.constant 0 : index
    %c130_59 = arith.constant 130 : index
    %93 = vector.load %arg9[%c0_58, %c130_59] : memref<2x512xf32, #tpu.memory_space<vmem>>, vector<2x256xf32>
    %cst_60 = arith.constant 0xFF800000 : f32
    %94 = vector.shape_cast %7 : vector<1x256xi1> to vector<1x256xi1>
    %95 = vector.broadcast %94 : vector<1x256xi1> to vector<2x256xi1>
    %96 = vector.broadcast %cst_60 : f32 to vector<2x256xf32>
    %97 = arith.select %95, %93, %96 : vector<2x256xi1>, vector<2x256xf32>
    %98 = arith.maximumf %92, %97 : vector<2x256xf32>
    %c0_61 = arith.constant 0 : index
    %c126_62 = arith.constant 126 : index
    %99 = vector.load %arg9[%c0_61, %c126_62] : memref<2x512xf32, #tpu.memory_space<vmem>>, vector<2x256xf32>
    %cst_63 = arith.constant 0xFF800000 : f32
    %100 = vector.shape_cast %11 : vector<1x256xi1> to vector<1x256xi1>
    %101 = vector.broadcast %100 : vector<1x256xi1> to vector<2x256xi1>
    %102 = vector.broadcast %cst_63 : f32 to vector<2x256xf32>
    %103 = arith.select %101, %99, %102 : vector<2x256xi1>, vector<2x256xf32>
    %104 = arith.maximumf %98, %103 : vector<2x256xf32>
    %c0_64 = arith.constant 0 : index
    %c0_65 = arith.constant 0 : index
    %105 = vector.load %arg10[%c0_64, %c0_65] : memref<4x256xf32, #tpu.memory_space<vmem>>, vector<4x256xf32>
    %c2 = arith.constant 2 : index
    %c0_66 = arith.constant 0 : index
    %c0_67 = arith.constant 0 : index
    %106 = vector.load %arg6[%c2, %c0_66, %c0_67] : memref<4x4x2xf32, #tpu.memory_space<vmem>>, vector<1x4x2xf32>
    %107 = vector.shape_cast %106 : vector<1x4x2xf32> to vector<4x2xf32>
    %cst_68 = arith.constant dense<0.000000e+00> : vector<4x256xf32>
    %108 = tpu.matmul %107, %104, %cst_68 {dimension_numbers = #tpu.dot_dimension_numbers<[1], [0], [0], [1], [0, 0, 1, 1], [], []>} : vector<4x2xf32>, vector<2x256xf32>, vector<4x256xf32> -> vector<4x256xf32>
    %109 = arith.addf %105, %108 : vector<4x256xf32>
    %c0_69 = arith.constant 0 : index
    %c0_70 = arith.constant 0 : index
    %110 = vector.load %arg10[%c0_69, %c0_70] : memref<4x256xf32, #tpu.memory_space<vmem>>, vector<4x256xf32>
    tpu.vector_store %arg10[%c0_69, %c0_70], %109 {strides = array<i32>} : memref<4x256xf32, #tpu.memory_space<vmem>>, vector<4x256xf32>,
    %c0_71 = arith.constant 0 : index
    %c128_72 = arith.constant 128 : index
    %111 = vector.load %arg9[%c0_71, %c128_72] : memref<2x512xf32, #tpu.memory_space<vmem>>, vector<2x256xf32>
    tpu.vector_store %arg9[%c0_71, %c128_72], %104 {strides = array<i32>} : memref<2x512xf32, #tpu.memory_space<vmem>>, vector<2x256xf32>,
    %c0_73 = arith.constant 0 : index
    %c144_74 = arith.constant 144 : index
    %112 = vector.load %arg9[%c0_73, %c144_74] : memref<2x512xf32, #tpu.memory_space<vmem>>, vector<2x256xf32>
    %113 = arith.maximumf %104, %112 : vector<2x256xf32>
    %c0_75 = arith.constant 0 : index
    %c112_76 = arith.constant 112 : index
    %114 = vector.load %arg9[%c0_75, %c112_76] : memref<2x512xf32, #tpu.memory_space<vmem>>, vector<2x256xf32>
    %115 = arith.maximumf %113, %114 : vector<2x256xf32>
    %c0_77 = arith.constant 0 : index
    %c160_78 = arith.constant 160 : index
    %116 = vector.load %arg9[%c0_77, %c160_78] : memref<2x512xf32, #tpu.memory_space<vmem>>, vector<2x256xf32>
    %117 = arith.maximumf %115, %116 : vector<2x256xf32>
    %c0_79 = arith.constant 0 : index
    %c96_80 = arith.constant 96 : index
    %118 = vector.load %arg9[%c0_79, %c96_80] : memref<2x512xf32, #tpu.memory_space<vmem>>, vector<2x256xf32>
    %119 = arith.maximumf %117, %118 : vector<2x256xf32>
    %c0_81 = arith.constant 0 : index
    %c128_82 = arith.constant 128 : index
    %120 = vector.load %arg9[%c0_81, %c128_82] : memref<2x512xf32, #tpu.memory_space<vmem>>, vector<2x256xf32>
    tpu.vector_store %arg9[%c0_81, %c128_82], %119 {strides = array<i32>} : memref<2x512xf32, #tpu.memory_space<vmem>>, vector<2x256xf32>,
    %c0_83 = arith.constant 0 : index
    %c129_84 = arith.constant 129 : index
    %121 = vector.load %arg9[%c0_83, %c129_84] : memref<2x512xf32, #tpu.memory_space<vmem>>, vector<2x256xf32>
    %cst_85 = arith.constant 0xFF800000 : f32
    %122 = vector.shape_cast %5 : vector<1x256xi1> to vector<1x256xi1>
    %123 = vector.broadcast %122 : vector<1x256xi1> to vector<2x256xi1>
    %124 = vector.broadcast %cst_85 : f32 to vector<2x256xf32>
    %125 = arith.select %123, %121, %124 : vector<2x256xi1>, vector<2x256xf32>
    %126 = arith.maximumf %119, %125 : vector<2x256xf32>
    %c0_86 = arith.constant 0 : index
    %c127_87 = arith.constant 127 : index
    %127 = vector.load %arg9[%c0_86, %c127_87] : memref<2x512xf32, #tpu.memory_space<vmem>>, vector<2x256xf32>
    %cst_88 = arith.constant 0xFF800000 : f32
    %128 = vector.shape_cast %9 : vector<1x256xi1> to vector<1x256xi1>
    %129 = vector.broadcast %128 : vector<1x256xi1> to vector<2x256xi1>
    %130 = vector.broadcast %cst_88 : f32 to vector<2x256xf32>
    %131 = arith.select %129, %127, %130 : vector<2x256xi1>, vector<2x256xf32>
    %132 = arith.maximumf %126, %131 : vector<2x256xf32>
    %c0_89 = arith.constant 0 : index
    %c130_90 = arith.constant 130 : index
    %133 = vector.load %arg9[%c0_89, %c130_90] : memref<2x512xf32, #tpu.memory_space<vmem>>, vector<2x256xf32>
    %cst_91 = arith.constant 0xFF800000 : f32
    %134 = vector.shape_cast %7 : vector<1x256xi1> to vector<1x256xi1>
    %135 = vector.broadcast %134 : vector<1x256xi1> to vector<2x256xi1>
    %136 = vector.broadcast %cst_91 : f32 to vector<2x256xf32>
    %137 = arith.select %135, %133, %136 : vector<2x256xi1>, vector<2x256xf32>
    %138 = arith.maximumf %132, %137 : vector<2x256xf32>
    %c0_92 = arith.constant 0 : index
    %c126_93 = arith.constant 126 : index
    %139 = vector.load %arg9[%c0_92, %c126_93] : memref<2x512xf32, #tpu.memory_space<vmem>>, vector<2x256xf32>
    %cst_94 = arith.constant 0xFF800000 : f32
    %140 = vector.shape_cast %11 : vector<1x256xi1> to vector<1x256xi1>
    %141 = vector.broadcast %140 : vector<1x256xi1> to vector<2x256xi1>
    %142 = vector.broadcast %cst_94 : f32 to vector<2x256xf32>
    %143 = arith.select %141, %139, %142 : vector<2x256xi1>, vector<2x256xf32>
    %144 = arith.maximumf %138, %143 : vector<2x256xf32>
    %c0_95 = arith.constant 0 : index
    %c0_96 = arith.constant 0 : index
    %145 = vector.load %arg10[%c0_95, %c0_96] : memref<4x256xf32, #tpu.memory_space<vmem>>, vector<4x256xf32>
    %c3 = arith.constant 3 : index
    %c0_97 = arith.constant 0 : index
    %c0_98 = arith.constant 0 : index
    %146 = vector.load %arg6[%c3, %c0_97, %c0_98] : memref<4x4x2xf32, #tpu.memory_space<vmem>>, vector<1x4x2xf32>
    %147 = vector.shape_cast %146 : vector<1x4x2xf32> to vector<4x2xf32>
    %cst_99 = arith.constant dense<0.000000e+00> : vector<4x256xf32>
    %148 = tpu.matmul %147, %144, %cst_99 {dimension_numbers = #tpu.dot_dimension_numbers<[1], [0], [0], [1], [0, 0, 1, 1], [], []>} : vector<4x2xf32>, vector<2x256xf32>, vector<4x256xf32> -> vector<4x256xf32>
    %149 = arith.addf %145, %148 : vector<4x256xf32>
    %c0_100 = arith.constant 0 : index
    %c0_101 = arith.constant 0 : index
    %150 = vector.load %arg10[%c0_100, %c0_101] : memref<4x256xf32, #tpu.memory_space<vmem>>, vector<4x256xf32>
    tpu.vector_store %arg10[%c0_100, %c0_101], %149 {strides = array<i32>} : memref<4x256xf32, #tpu.memory_space<vmem>>, vector<4x256xf32>,
    %c0_i32_102 = arith.constant 0 : i32
    %151 = arith.cmpi eq, %arg1, %c0_i32_102 : i32
    %152 = arith.extui %151 : i1 to i32
    %c0_i32_103 = arith.constant 0 : i32
    %153 = arith.cmpi ne, %152, %c0_i32_103 : i32
    scf.if %153 {
      %c0_104 = arith.constant 0 : index
      %c0_105 = arith.constant 0 : index
      %154 = vector.load %arg10[%c0_104, %c0_105] : memref<4x256xf32, #tpu.memory_space<vmem>>, vector<4x256xf32>
      %c0_106 = arith.constant 0 : index
      %c0_107 = arith.constant 0 : index
      %155 = vector.load %arg7[%c0_106, %c0_107] : memref<4x1xf32, #tpu.memory_space<vmem>>, vector<4x1xf32>
      %156 = vector.broadcast %155 : vector<4x1xf32> to vector<4x256xf32>
      %157 = arith.addf %154, %156 : vector<4x256xf32>
      %158 = arith.negf %157 : vector<4x256xf32>
      %159 = math.exp %158 : vector<4x256xf32>
      %cst_108 = arith.constant 1.000000e+00 : f32
      %160 = vector.broadcast %cst_108 : f32 to vector<4x256xf32>
      %161 = arith.addf %160, %159 : vector<4x256xf32>
      %162 = arith.divf %160, %161 : vector<4x256xf32>
      %163 = arith.mulf %157, %162 : vector<4x256xf32>
      %c0_109 = arith.constant 0 : index
      %c0_110 = arith.constant 0 : index
      %c0_111 = arith.constant 0 : index
      %164 = vector.load %arg8[%c0_109, %c0_110, %c0_111] : memref<1x4x256xf32, #tpu.memory_space<vmem>>, vector<1x4x256xf32>
      %165 = vector.shape_cast %164 : vector<1x4x256xf32> to vector<4x256xf32>
      %166 = vector.shape_cast %163 : vector<4x256xf32> to vector<1x4x256xf32>
      tpu.vector_store %arg8[%c0_109, %c0_110, %c0_111], %166 {strides = array<i32>} : memref<1x4x256xf32, #tpu.memory_space<vmem>>, vector<1x4x256xf32>,
    } else {
    }
    return
  }
  func.func @transform_0(%arg0: i32, %arg1: i32) -> (i32, i32) {
    %c0_i32 = arith.constant 0 : i32
    %c0_i32_0 = arith.constant 0 : i32
    %c0_i32_1 = arith.constant 0 : i32
    return %c0_i32, %c0_i32_0 : i32, i32
  }
  func.func @transform_1(%arg0: i32, %arg1: i32) -> (i32, i32, i32) {
    %c0_i32 = arith.constant 0 : i32
    %c0_i32_0 = arith.constant 0 : i32
    %c0_i32_1 = arith.constant 0 : i32
    return %arg0, %c0_i32, %c0_i32_0 : i32, i32, i32
  }
  func.func @transform_2(%arg0: i32, %arg1: i32) -> (i32, i32) {
    %c0_i32 = arith.constant 0 : i32
    %c0_i32_0 = arith.constant 0 : i32
    return %arg1, %c0_i32 : i32, i32
  }
  func.func @transform_3(%arg0: i32, %arg1: i32) -> (i32, i32) {
    %c0_i32 = arith.constant 0 : i32
    %c0_i32_0 = arith.constant 0 : i32
    return %arg1, %c0_i32 : i32, i32
  }
  func.func @transform_4(%arg0: i32, %arg1: i32) -> (i32, i32, i32) {
    %c0_i32 = arith.constant 0 : i32
    %c0_i32_0 = arith.constant 0 : i32
    %c0_i32_1 = arith.constant 0 : i32
    return %c0_i32, %c0_i32_0, %arg1 : i32, i32, i32
  }
  func.func @transform_5(%arg0: i32, %arg1: i32) -> (i32, i32) {
    %c0_i32 = arith.constant 0 : i32
    %c0_i32_0 = arith.constant 0 : i32
    %c0_i32_1 = arith.constant 0 : i32
    return %c0_i32, %c0_i32_0 : i32, i32
  }
  func.func @transform_6(%arg0: i32, %arg1: i32) -> (i32, i32, i32) {
    %c0_i32 = arith.constant 0 : i32
    %c0_i32_0 = arith.constant 0 : i32
    %c0_i32_1 = arith.constant 0 : i32
    return %arg0, %c0_i32, %c0_i32_0 : i32, i32, i32
  }
}

</mosaic_0001>

<bundles_post_ra>
// kernel: tpu_custom_call.1
= control target key start
LH: loop header
LB: loop body
LE: loop exit
PB: predicated region body
PF: predicated region fallthrough
CT: control target
= control target key end

     0   :  { %11 = vsyncpa [#allocation5], 0  ;;  %s2251_s0 = inlined_call_operand.vmem [shape: s32[1,256], index: 0, kind: input, shape index: {}]   ;;  %s2252_s1 = inlined_call_operand.vmem [shape: f32[2,4,256], index: 1, kind: input, shape index: {}]   ;;  %s2253_s2 = inlined_call_operand.vmem [shape: f32[2,4], index: 2, kind: input, shape index: {}]   ;;  %s2254_s3 = inlined_call_operand.vmem [shape: f32[2,1], index: 3, kind: input, shape index: {}]   ;;  %s2255_s4 = inlined_call_operand.vmem [shape: f32[4,4,2], index: 4, kind: input, shape index: {}]   ;;  %s2256_s5 = inlined_call_operand.vmem [shape: f32[4,1], index: 5, kind: input, shape index: {}]   ;;  %s2257_s6 = inlined_call_operand.hbm [shape: f32[2,4,256], index: 6, kind: output, shape index: {}]  }
   0x1   :  { %13 = vsyncpa [#allocation5 + $0x1], 0  ;;  %s1852_s21 = smov 0   ;;  %s1854_s22 = smov 0  }
   0x2   :  { %s1856_s23 = smov 0   ;;  %s1858_s24 = smov 0  }
   0x3   :  { %s1860_s25 = smov 0   ;;  %s1862_s26 = smov 0  }
   0x4 LB: > { %s1584_s27 = sadd.s32 4294967295, %s1801_s26   ;;  %s1585_s28 = sadd.s32 4294967294, %s1801_s26   ;;  %s1801_s26 = sphi %s1862_s26, %s19_s26   ;;  %s1797_s25 = sphi %s1860_s25, %s2294_s25   ;;  %s1793_s24 = sphi %s1858_s24, %s2293_s24   ;;  %s1789_s23 = sphi %s1856_s23, %s2292_s23   ;;  %s1785_s22 = sphi %s1854_s22, %s2291_s22   ;;  %s1781_s21 = sphi %s1852_s21, %s2290_s21  }
   0x5   : > { %s31_s29 = sadd.s32 1, %s1797_s25  ;;  %s184_s30 = sadd.s32 1, %s1789_s23 }
   0x6   : > { %p33_p0 = scmp.ge.s32.totalorder %s31_s29, 2  ;;  %p194_p1 = scmp.ne.s32.totalorder %s1789_s23, %s1785_s22 }
   0x7   : > { %p195_p2 = scmp.eq.s32.totalorder %s1584_s27, 1  ;;  %p200_p3 = scmp.ne.s32.totalorder %s1785_s22, %s1781_s21 }
   0x8   : > { %s2296_s29 = smov (%p33_p0, %s31_s29), 0  ;;  %p201_p5 = scmp.eq.s32.totalorder %s1585_s28, 1 }
   0x9   : > { %p1892_p4 = por %p195_p2, %p194_p1  ;;  %s181_s8 = ssub.s32 %s1797_s25, %s2296_s29 }
   0xa   : > { %p1591_p6 = scmp.ge.s32.totalorder %s1801_s26, 1  ;;  %p182_p7 = scmp.eq.s32.totalorder %s181_s8, 0 }
   0xb   : > { %p1899_p8 = por %p201_p5, %p200_p3  ;;  %p254_p9 = scmp.lt.s32.totalorder %s1801_s26, 3 }
   0xc   : > { %s1905_s10 = scalar_select %p182_p7, %s1789_s23, %s184_s30  }
   0xd   : > { %p255_p10 = pnand %p1591_p6, %p254_p9 }
   0xe   : > { %p296_p11 = scmp.lt.s32.totalorder (!%p255_p10), %s1793_s24, 1  ;;  %v1803_v0 = vmov (!%p255_p10), 0.0   ;;  %v327_v1 = vld [vmem:[%s2254_s3] sm:$0x3] (!%p255_p10)  ;;  %v1804_v2 = vmov (!%p255_p10), 0   ;;  %vm339_vm0 = vcmask (!%p255_p10), 1043456   ;;  %v535_v24 = vlaneseq (!%p255_p10) }
   0xf   : > { %258 = sbr.rel (%p255_p10) target bundleno = 1445 (0x5a5), region = 44  ;;  %408 = vmatprep.mubr.f32.mxu0 (!%p255_p10), %v1803_v0  ;;  %506 = vmatprep.mubr.f32.mxu1 (!%p255_p10), %v1803_v0  ;;  %v325_v5 = vld [vmem:[%s2253_s2] sm:$0x3] (!%p255_p10)  ;;  %vm335_vm1 = vcmask (!%p255_p10), 31744   ;;  %v1805_v6 = vmov (!%p255_p10), -inf   ;;  %vm2261_vm2 = vcmask (!%p255_p10), 1041408  }
  0x10   : > { %1697 = vset.pattern.permute.xlu0 (!%p255_p10), %v1804_v2  ;;  %1698 = vset.pattern.permute.xlu1 (!%p255_p10), %v1804_v2  ;;  %318 = vst [vmem:[#allocation2 + $0x6] sm:$0x3] (!%p255_p10), %v1805_v6  ;;  %317 = vst [vmem:[#allocation2] sm:$0x3] (!%p255_p10), %v1805_v6  ;;  %v1806_v22 = vmov (!%p255_p10), 1983009808  }
  0x11   : > { %330 = vperm.xlu0 (!%p255_p10), %1697, %v327_v1   ;;  %v533_v23 = vunpack.c.l.s4 (!%p255_p10), %v1806_v22  ;;  %v1925_v27 = vshrl.u32 (!%p255_p10), %v535_v24, 7  ;;  %s1807_s20 = smov (!%p255_p10), 96   ;;  %s1808_s27 = smov (!%p255_p10), 112   ;;  %vm553_vm3 = vcmask (!%p255_p10), 916480   ;;  %vm584_vm4 = vcmask (!%p255_p10), 130048  }
  0x12   : > { %s1809_s28 = smov (!%p255_p10), 16   ;;  %s1810_s30 = smov (!%p255_p10), 32   ;;  %vm2260_vm5 = vcmask (!%p255_p10), 785408   ;;  %vm2259_vm6 = vcmask (!%p255_p10), 261120   ;;  %vm664_vm10 = vcmask (!%p255_p10), 1039360   ;;  %vm2258_vm14 = vcmask (!%p255_p10), 7168  }
  0x13   : > { %v534_v26 = vunpack.c.0.s8 (!%p255_p10), %v533_v23  ;;  %s1811_s8 = smov (!%p255_p10), 1   ;;  %s1812_s11 = smov (!%p255_p10), 127  }
  0x14   : > { %s1813_s12 = smov (!%p255_p10), 2  }
  0x15   : > { %v1928_v28 = vsub.s32 (!%p255_p10), %v534_v26, %v1925_v27 }
  0x16   : > { %s297_s13 = scalar_select %p296_p11, %s1793_s24, 1 }
  0x18   : > { %s1627_s14 = sshll.u32 %s297_s13, 3  ;;  %s1814_s13 = smov 126  }
  0x19   : > { %s300_s17 = scalar_lea.vmem %s2252_s1, %s1627_s14  ;;  %s1628_s14 = sshll.u32 %s1793_s24, 7 }
  0x1a   : > { %v326_v3 = vld [vmem:[%s300_s17] sm:$0xff]  ;;  %s2204_s19 = scalar_lea.hbm %s2257_s6, %s1628_s14  ;;  %s1816_s24 = smov [#allocation4]  }
  0x1b   : > { %v334_v4 = vcombine.high %v326_v3, %v326_v3 }
  0x1d   : > { %1595 = vmatprep.subr.msk.mxu0 %vm339_vm0, %v334_v4 }
  0x1e   : > { %1596 = vmatpush1.msk.msra.mxu0 %vm339_vm0, %v326_v3 }
  0x1f   : > { %1597 = vmatmul.mubr.msk.f32.vlgmr.msra.gmra.mrb[0].mxu0 %vm335_vm1, %v325_v5  ;;  %vm734_vm1 = vcmask 1031168  }
  0x20   : > { %844 = vmatprep.mubr.f32.mxu0 %v1803_v0 }
  0x90   : > { %v331_v7 = vpop.permute.xlu0 %330 }
  0xf2   : > { %v410_v8 = vpop.f32.mrb[0].mxu0 }
  0xf3   : > { %v411_v9 = vadd.f32 %v410_v8, %v331_v7  ;;  %v412_v10 = vpop.f32.mrb[1].mxu0 }
  0xf4   : > { %v413_v11 = vadd.f32 %v412_v10, %v331_v7 }
  0xf5   : > { %v1598_v12 = vmul.f32 -1.442695, %v411_v9 }
  0xf6   : > { %v1599_v13 = vmul.f32 -1.442695, %v413_v11 }
  0xf7   : > { %1711 = vpow2.f32 %v1598_v12 }
  0xf8   : > { %1713 = vpow2.f32 %v1599_v13 }
 0x101   : > { %v1712_v14 = vpop.eup %1711 }
 0x102   : > { %v1714_v15 = vpop.eup %1713  ;;  %v421_v16 = vadd.f32 1.0, %v1712_v14 }
 0x103   : > { %v422_v17 = vadd.f32 1.0, %v1714_v15 }
 0x104   : > { %1715 = vrcp.f32 %v421_v16  ;;  %v320_v16 = vld [vmem:[%s2251_s0] sm:$0x3] }
 0x105   : > { %1717 = vrcp.f32 %v422_v17  ;;  %vm321_vm7 = vcmp.lt.s32.totalorder %v320_v16, 15  ;;  %vm323_vm8 = vcmp.ge.s32.totalorder %v320_v16, 1  ;;  %vm322_vm9 = vcmp.lt.s32.totalorder %v320_v16, 14 }
 0x106   : > { %v674_v26 = vsel %vm323_vm8, 1, %v1804_v2  ;;  %vm324_vm11 = vcmp.ge.s32.totalorder %v320_v16, 2 }
 0x10e   : > { %v1716_v18 = vpop.eup %1715 }
 0x10f   : > { %v1718_v19 = vpop.eup %1717  ;;  %v427_v20 = vmul.f32 %v1716_v18, %v411_v9 }
 0x110   : > { %v428_v21 = vmul.f32 %v1718_v19, %v413_v11  ;;  %v633_v19 = vsub.s32 0, %v1925_v27 }
 0x112   : > { %v519_v25 = vcombine.low %v427_v20, %v428_v21  ;;  %1600 = vmatprep.subr.msk.mxu1 %vm2261_vm2, %v428_v21 }
 0x113   : > { %1601 = vmatpush1.msk.msra.mxu1 %vm2261_vm2, %v427_v20 }
 0x114   : > { %1603 = vst.sshfl [vmem:[#allocation2 + $0x2] sm:$0x33 pattern:$0x76325410] %v519_v25 }
 0x11b   : > { %v529_v29 = vld [vmem:[#allocation2 + $0x2] sm:$0x3f] }
 0x11c   : > { %v538_v30 = vrot.slane %v529_v29, %v1928_v28  ;;  %v560_v31 = vld [vmem:[#allocation2] sm:$0x3f]  ;;  %v531_v34 = vcombine.high %v529_v29, %v529_v29 }
 0x11d   : > { %v569_v32 = vrot.slane %v560_v31, %v1928_v28  ;;  %v562_v36 = vcombine.high %v560_v31, %v560_v31  ;;  %v717_v31 = vsel %vm322_vm9, 1, %v1804_v2  ;;  %vm431_vm9 = vcmask 15360  }
 0x11e   : > { %591 = vrot.lane.b32.xlu1 %v538_v30, %s1807_s20  ;;  %547 = vrot.lane.b32.xlu0 %v538_v30, %s1808_s27  ;;  %v546_v33 = vcombine.high %v538_v30, %v538_v30  ;;  %v545_v35 = vrot.slane %v531_v34, %v1928_v28 }
 0x11f   : > { %v576_v37 = vrot.slane %v562_v36, %v1928_v28  ;;  %v577_v38 = vcombine.high %v569_v32, %v569_v32 }
 0x122   : > { %578 = vrot.lane.b32.xlu0 %v569_v32, %s1809_s28  ;;  %549 = vrot.lane.b32.xlu1 %v546_v33, %s1808_s27 }
 0x126   : > { %604 = vrot.lane.b32.xlu0 %v569_v32, %s1810_s30  ;;  %551 = vrot.lane.b32.xlu1 %v545_v35, %s1808_s27  ;;  %v678_v32 = vrot.slane %v674_v26, %v633_v19 }
 0x128   : > { %vm1995_vm15 = vcmp.eq.s32.totalorder %v678_v32, 1 }
 0x12a   : > { %582 = vrot.lane.b32.xlu0 %v576_v37, %s1809_s28  ;;  %580 = vrot.lane.b32.xlu1 %v577_v38, %s1809_s28 }
 0x12e   : > { %593 = vrot.lane.b32.xlu0 %v546_v33, %s1807_s20  ;;  %595 = vrot.lane.b32.xlu1 %v545_v35, %s1807_s20 }
 0x132   : > { %608 = vrot.lane.b32.xlu0 %v576_v37, %s1810_s30  ;;  %606 = vrot.lane.b32.xlu1 %v577_v38, %s1810_s30  ;;  %v721_v38 = vrot.slane %v717_v31, %v633_v19 }
 0x190   : > { %v592_v39 = vpop.permute.xlu1 %591  ;;  %v548_v40 = vpop.permute.xlu0 %547 }
 0x194   : > { %v579_v41 = vpop.permute.xlu0 %578  ;;  %v550_v42 = vpop.permute.xlu1 %549 }
 0x195   : > { %v554_v47 = vsel %vm553_vm3, %v548_v40, %v550_v42 }
 0x196   : > { %v558_v51 = vmax.f32 %v427_v20, %v554_v47  ;;  %v637_v20 = vsub.s32 1, %v1925_v27 }
 0x198   : > { %v605_v43 = vpop.permute.xlu0 %604  ;;  %v552_v44 = vpop.permute.xlu1 %551  ;;  %v682_v33 = vrot.slane %v674_v26, %v637_v20 }
 0x199   : > { %v555_v48 = vsel %vm553_vm3, %v550_v42, %v552_v44  ;;  %v743_v42 = vsel %vm324_vm11, 1, %v1804_v2 }
 0x19a   : > { %v559_v52 = vmax.f32 %v428_v21, %v555_v48  ;;  %v630_v21 = vsel %vm321_vm7, 1, %v1804_v2  ;;  %vm1999_vm0 = vcmp.eq.s32.totalorder %v682_v33, 1  ;;  %vm2009_vm7 = vcmp.eq.s32.totalorder %v721_v38, 1 }
 0x19b   : > { %v634_v24 = vrot.slane %v630_v21, %v633_v19  ;;  %v638_v25 = vrot.slane %v630_v21, %v637_v20 }
 0x19c   : > { %v583_v45 = vpop.permute.xlu0 %582  ;;  %v581_v46 = vpop.permute.xlu1 %580 }
 0x19d   : > { %v585_v49 = vsel %vm584_vm4, %v579_v41, %v581_v46  ;;  %v586_v50 = vsel %vm584_vm4, %v581_v46, %v583_v45  ;;  %vm1984_vm12 = vcmp.eq.s32.totalorder %v634_v24, 1  ;;  %vm1988_vm13 = vcmp.eq.s32.totalorder %v638_v25, 1 }
 0x19e   : > { %v589_v57 = vmax.f32 %v558_v51, %v585_v49  ;;  %v590_v58 = vmax.f32 %v559_v52, %v586_v50  ;;  %v747_v50 = vrot.slane %v743_v42, %v633_v19  ;;  %v751_v51 = vrot.slane %v743_v42, %v637_v20  ;;  %v1617_v49 = vld [vmem:[%s2255_s4 + $0xc] sm:$0xf] }
 0x1a0   : > { %v594_v53 = vpop.permute.xlu0 %593  ;;  %v596_v54 = vpop.permute.xlu1 %595  ;;  %vm2029_vm11 = vcmp.eq.s32.totalorder %v747_v50, 1 }
 0x1a1   : > { %v598_v55 = vsel %vm2260_vm5, %v592_v39, %v594_v53  ;;  %v599_v56 = vsel %vm2260_vm5, %v594_v53, %v596_v54  ;;  %v725_v39 = vrot.slane %v717_v31, %v637_v20 }
 0x1a2   : > { %v602_v59 = vmax.f32 %v589_v57, %v598_v55  ;;  %v603_v60 = vmax.f32 %v590_v58, %v599_v56 }
 0x1a3   : > { %vm2013_vm8 = vcmp.eq.s32.totalorder %v725_v39, 1 }
 0x1a4   : > { %v609_v61 = vpop.permute.xlu0 %608  ;;  %v607_v62 = vpop.permute.xlu1 %606 }
 0x1a5   : > { %v611_v63 = vsel %vm2259_vm6, %v605_v43, %v607_v62  ;;  %v612_v1 = vsel %vm2259_vm6, %v607_v62, %v609_v61 }
 0x1a6   : > { %v1954_v3 = vmax.f32 %v602_v59, %v611_v63  ;;  %v1956_v4 = vmax.f32 %v603_v60, %v612_v1 }
 0x1a8   : > { %v619_v5 = vcombine.low %v1954_v3, %v1956_v4 }
 0x1aa   : > { %1604 = vst.sshfl [vmem:[#allocation2 + $0x2] sm:$0x33 pattern:$0x76325410] %v619_v5 }
 0x1b1   : > { %v673_v6 = vld [vmem:[#allocation2] sm:$0x3f] }
 0x1b2   : > { %v629_v7 = vld [vmem:[#allocation2 + $0x2] sm:$0x3f]  ;;  %v693_v8 = vrot.slane %v673_v6, %v1928_v28  ;;  %v686_v13 = vcombine.high %v673_v6, %v673_v6 }
 0x1b3   : > { %v649_v9 = vrot.slane %v629_v7, %v1928_v28  ;;  %v642_v10 = vcombine.high %v629_v7, %v629_v7 }
 0x1b4   : > { %702 = vrot.lane.b32.xlu0 %v693_v8, %s1811_s8  ;;  %v700_v14 = vrot.slane %v686_v13, %v1928_v28  ;;  %v701_v15 = vcombine.high %v693_v8, %v693_v8 }
 0x1b5   : > { %658 = vrot.lane.b32.xlu1 %v649_v9, %s1812_s11  ;;  %v657_v11 = vcombine.high %v649_v9, %v649_v9  ;;  %v656_v12 = vrot.slane %v642_v10, %v1928_v28 }
 0x1b8   : > { %754 = vrot.lane.b32.xlu0 %v693_v8, %s1813_s12 }
 0x1b9   : > { %728 = vrot.lane.b32.xlu1 %v649_v9, %s1814_s13 }
 0x1bc   : > { %660 = vrot.lane.b32.xlu0 %v657_v11, %s1812_s11 }
 0x1bd   : > { %662 = vrot.lane.b32.xlu1 %v656_v12, %s1812_s11 }
 0x1c0   : > { %706 = vrot.lane.b32.xlu0 %v700_v14, %s1811_s8 }
 0x1c1   : > { %704 = vrot.lane.b32.xlu1 %v701_v15, %s1811_s8 }
 0x1c4   : > { %730 = vrot.lane.b32.xlu0 %v657_v11, %s1814_s13 }
 0x1c5   : > { %732 = vrot.lane.b32.xlu1 %v656_v12, %s1814_s13 }
 0x1c8   : > { %758 = vrot.lane.b32.xlu0 %v700_v14, %s1813_s12 }
 0x1c9   : > { %756 = vrot.lane.b32.xlu1 %v701_v15, %s1813_s12 }
 0x226   : > { %v703_v17 = vpop.permute.xlu0 %702 }
 0x227   : > { %v659_v18 = vpop.permute.xlu1 %658 }
 0x22a   : > { %v755_v22 = vpop.permute.xlu0 %754 }
 0x22b   : > { %v729_v23 = vpop.permute.xlu1 %728 }
 0x22e   : > { %v661_v29 = vpop.permute.xlu0 %660 }
 0x22f   : > { %v663_v30 = vpop.permute.xlu1 %662  ;;  %v665_v36 = vsel %vm664_vm10, %v659_v18, %v661_v29 }
 0x230   : > { %v666_v37 = vsel %vm664_vm10, %v661_v29, %v663_v30  ;;  %v669_v47 = vsel %vm1984_vm12, %v665_v36, -inf }
 0x231   : > { %v670_v48 = vsel %vm1988_vm13, %v666_v37, -inf  ;;  %v671_v56 = vmax.f32 %v1954_v3, %v669_v47 }
 0x232   : > { %v707_v40 = vpop.permute.xlu0 %706  ;;  %v672_v57 = vmax.f32 %v1956_v4, %v670_v48 }
 0x233   : > { %v705_v41 = vpop.permute.xlu1 %704 }
 0x234   : > { %v709_v45 = vsel %vm2258_vm14, %v703_v17, %v705_v41  ;;  %v710_v46 = vsel %vm2258_vm14, %v705_v41, %v707_v40  ;;  %vm2033_vm14 = vcmp.eq.s32.totalorder %v751_v51, 1 }
 0x235   : > { %v713_v52 = vsel %vm1995_vm15, %v709_v45, -inf  ;;  %v714_v53 = vsel %vm1999_vm0, %v710_v46, -inf }
 0x236   : > { %v731_v54 = vpop.permute.xlu0 %730  ;;  %v715_v62 = vmax.f32 %v671_v56, %v713_v52  ;;  %v716_v63 = vmax.f32 %v672_v57, %v714_v53 }
 0x237   : > { %v733_v55 = vpop.permute.xlu1 %732  ;;  %v735_v58 = vsel %vm734_vm1, %v729_v23, %v731_v54 }
 0x238   : > { %v736_v59 = vsel %vm734_vm1, %v731_v54, %v733_v55  ;;  %v739_v60 = vsel %vm2009_vm7, %v735_v58, -inf }
 0x239   : > { %v740_v61 = vsel %vm2013_vm8, %v736_v59, -inf  ;;  %v741_v6 = vmax.f32 %v715_v62, %v739_v60 }
 0x23a   : > { %v759_v4 = vpop.permute.xlu0 %758  ;;  %v742_v7 = vmax.f32 %v716_v63, %v740_v61 }
 0x23b   : > { %v757_v5 = vpop.permute.xlu1 %756 }
 0x23c   : > { %v760_v8 = vsel %vm431_vm9, %v755_v22, %v757_v5  ;;  %v761_v9 = vsel %vm431_vm9, %v757_v5, %v759_v4 }
 0x23d   : > { %v764_v10 = vsel %vm2029_vm11, %v760_v8, -inf  ;;  %v765_v11 = vsel %vm2033_vm14, %v761_v9, -inf }
 0x23e   : > { %v766_v12 = vmax.f32 %v741_v6, %v764_v10  ;;  %v767_v13 = vmax.f32 %v742_v7, %v765_v11  ;;  %v430_v11 = vld [vmem:[%s2255_s4] sm:$0xf] }
 0x23f   : > { %1602 = vmatmul.mubr.msk.f32.vlgmr.msra.gmra.mrb[0].mxu1 %vm431_vm9, %v430_v11 }
 0x240   : > { %v857_v14 = vcombine.low %v766_v12, %v767_v13  ;;  %1606 = vmatprep.subr.msk.mxu0 %vm2261_vm2, %v767_v13  ;;  %1131 = vmatprep.mubr.f32.mxu1 %v1803_v0 }
 0x241   : > { %1607 = vmatpush1.msk.msra.mxu0 %vm2261_vm2, %v766_v12 }
 0x242   : > { %1609 = vst.sshfl [vmem:[#allocation2 + $0x2] sm:$0x33 pattern:$0x76325410] %v857_v14 }
 0x249   : > { %v897_v15 = vld [vmem:[#allocation2] sm:$0x3f] }
 0x24a   : > { %v867_v16 = vld [vmem:[#allocation2 + $0x2] sm:$0x3f]  ;;  %v906_v17 = vrot.slane %v897_v15, %v1928_v28  ;;  %v899_v22 = vcombine.high %v897_v15, %v897_v15 }
 0x24b   : > { %v876_v18 = vrot.slane %v867_v16, %v1928_v28  ;;  %v869_v19 = vcombine.high %v867_v16, %v867_v16 }
 0x24c   : > { %915 = vrot.lane.b32.xlu0 %v906_v17, %s1809_s28  ;;  %v913_v23 = vrot.slane %v899_v22, %v1928_v28  ;;  %v914_v24 = vcombine.high %v906_v17, %v906_v17 }
 0x24d   : > { %885 = vrot.lane.b32.xlu1 %v876_v18, %s1808_s27  ;;  %v884_v20 = vcombine.high %v876_v18, %v876_v18  ;;  %v883_v21 = vrot.slane %v869_v19, %v1928_v28 }
 0x250   : > { %939 = vrot.lane.b32.xlu0 %v906_v17, %s1810_s30 }
 0x251   : > { %927 = vrot.lane.b32.xlu1 %v876_v18, %s1807_s20 }
 0x254   : > { %887 = vrot.lane.b32.xlu0 %v884_v20, %s1808_s27 }
 0x255   : > { %889 = vrot.lane.b32.xlu1 %v883_v21, %s1808_s27 }
 0x258   : > { %919 = vrot.lane.b32.xlu0 %v913_v23, %s1809_s28 }
 0x259   : > { %917 = vrot.lane.b32.xlu1 %v914_v24, %s1809_s28 }
 0x25c   : > { %929 = vrot.lane.b32.xlu0 %v884_v20, %s1807_s20 }
 0x25d   : > { %931 = vrot.lane.b32.xlu1 %v883_v21, %s1807_s20 }
 0x260   : > { %943 = vrot.lane.b32.xlu0 %v913_v23, %s1810_s30 }
 0x261   : > { %941 = vrot.lane.b32.xlu1 %v914_v24, %s1810_s30 }
 0x2be   : > { %v916_v25 = vpop.permute.xlu0 %915 }
 0x2bf   : > { %v886_v26 = vpop.permute.xlu1 %885 }
 0x2c2   : > { %v940_v29 = vpop.permute.xlu0 %939 }
 0x2c3   : > { %v928_v30 = vpop.permute.xlu1 %927 }
 0x2c6   : > { %v888_v31 = vpop.permute.xlu0 %887 }
 0x2c7   : > { %v890_v32 = vpop.permute.xlu1 %889  ;;  %v891_v37 = vsel %vm553_vm3, %v886_v26, %v888_v31 }
 0x2c8   : > { %v892_v38 = vsel %vm553_vm3, %v888_v31, %v890_v32  ;;  %v895_v41 = vmax.f32 %v766_v12, %v891_v37 }
 0x2c9   : > { %v896_v42 = vmax.f32 %v767_v13, %v892_v38 }
 0x2ca   : > { %v920_v33 = vpop.permute.xlu0 %919 }
 0x2cb   : > { %v918_v36 = vpop.permute.xlu1 %917 }
 0x2cc   : > { %v921_v39 = vsel %vm584_vm4, %v916_v25, %v918_v36  ;;  %v922_v40 = vsel %vm584_vm4, %v918_v36, %v920_v33 }
 0x2cd   : > { %v925_v50 = vmax.f32 %v895_v41, %v921_v39  ;;  %v926_v51 = vmax.f32 %v896_v42, %v922_v40 }
 0x2ce   : > { %v930_v45 = vpop.permute.xlu0 %929 }
 0x2cf   : > { %v932_v46 = vpop.permute.xlu1 %931  ;;  %v933_v47 = vsel %vm2260_vm5, %v928_v30, %v930_v45 }
 0x2d0   : > { %v934_v48 = vsel %vm2260_vm5, %v930_v45, %v932_v46  ;;  %v937_v52 = vmax.f32 %v925_v50, %v933_v47 }
 0x2d1   : > { %v938_v53 = vmax.f32 %v926_v51, %v934_v48 }
 0x2d2   : > { %v944_v54 = vpop.permute.xlu0 %943 }
 0x2d3   : > { %v942_v55 = vpop.permute.xlu1 %941 }
 0x2d4   : > { %v945_v56 = vsel %vm2259_vm6, %v940_v29, %v942_v55  ;;  %v946_v57 = vsel %vm2259_vm6, %v942_v55, %v944_v54  ;;  %vm2280_vm6 = vcmask 7168  }
 0x2d5   : > { %v949_v58 = vmax.f32 %v937_v52, %v945_v56  ;;  %v950_v59 = vmax.f32 %v938_v53, %v946_v57  ;;  %vm2281_vm5 = vmmov %vm2280_vm6 }
 0x2d7   : > { %v953_v60 = vcombine.low %v949_v58, %v950_v59 }
 0x2d9   : > { %1610 = vst.sshfl [vmem:[#allocation2 + $0x2] sm:$0x33 pattern:$0x76325410] %v953_v60 }
 0x2e0   : > { %v995_v61 = vld [vmem:[#allocation2] sm:$0x3f] }
 0x2e1   : > { %v963_v62 = vld [vmem:[#allocation2 + $0x2] sm:$0x3f]  ;;  %v1004_v63 = vrot.slane %v995_v61, %v1928_v28  ;;  %v997_v8 = vcombine.high %v995_v61, %v995_v61 }
 0x2e2   : > { %v972_v4 = vrot.slane %v963_v62, %v1928_v28  ;;  %v965_v5 = vcombine.high %v963_v62, %v963_v62 }
 0x2e3   : > { %1013 = vrot.lane.b32.xlu0 %v1004_v63, %s1811_s8  ;;  %v1011_v9 = vrot.slane %v997_v8, %v1928_v28  ;;  %v1012_v10 = vcombine.high %v1004_v63, %v1004_v63 }
 0x2e4   : > { %981 = vrot.lane.b32.xlu1 %v972_v4, %s1812_s11  ;;  %v980_v6 = vcombine.high %v972_v4, %v972_v4  ;;  %v979_v7 = vrot.slane %v965_v5, %v1928_v28 }
 0x2e7   : > { %1041 = vrot.lane.b32.xlu0 %v1004_v63, %s1813_s12 }
 0x2e8   : > { %1027 = vrot.lane.b32.xlu1 %v972_v4, %s1814_s13 }
 0x2eb   : > { %983 = vrot.lane.b32.xlu0 %v980_v6, %s1812_s11 }
 0x2ec   : > { %985 = vrot.lane.b32.xlu1 %v979_v7, %s1812_s11 }
 0x2ef   : > { %1017 = vrot.lane.b32.xlu0 %v1011_v9, %s1811_s8 }
 0x2f0   : > { %1015 = vrot.lane.b32.xlu1 %v1012_v10, %s1811_s8 }
 0x2f3   : > { %1029 = vrot.lane.b32.xlu0 %v980_v6, %s1814_s13 }
 0x2f4   : > { %1031 = vrot.lane.b32.xlu1 %v979_v7, %s1814_s13 }
 0x2f7   : > { %1045 = vrot.lane.b32.xlu0 %v1011_v9, %s1813_s12 }
 0x2f8   : > { %1043 = vrot.lane.b32.xlu1 %v1012_v10, %s1813_s12 }
 0x355   : > { %v1014_v12 = vpop.permute.xlu0 %1013 }
 0x356   : > { %v982_v13 = vpop.permute.xlu1 %981 }
 0x359   : > { %v1042_v14 = vpop.permute.xlu0 %1041 }
 0x35a   : > { %v1028_v15 = vpop.permute.xlu1 %1027 }
 0x35d   : > { %v984_v16 = vpop.permute.xlu0 %983 }
 0x35e   : > { %v986_v17 = vpop.permute.xlu1 %985  ;;  %v987_v18 = vsel %vm664_vm10, %v982_v13, %v984_v16 }
 0x35f   : > { %v988_v19 = vsel %vm664_vm10, %v984_v16, %v986_v17  ;;  %v991_v24 = vsel %vm1984_vm12, %v987_v18, -inf }
 0x360   : > { %v992_v25 = vsel %vm1988_vm13, %v988_v19, -inf  ;;  %v993_v32 = vmax.f32 %v949_v58, %v991_v24 }
 0x361   : > { %v1018_v20 = vpop.permute.xlu0 %1017  ;;  %v994_v33 = vmax.f32 %v950_v59, %v992_v25 }
 0x362   : > { %v1016_v21 = vpop.permute.xlu1 %1015 }
 0x363   : > { %v1019_v22 = vsel %vm2280_vm6, %v1014_v12, %v1016_v21  ;;  %v1020_v23 = vsel %vm2281_vm5, %v1016_v21, %v1018_v20  ;;  %vm2282_vm5 = vcmask 785408  }
 0x364   : > { %v1023_v26 = vsel %vm1995_vm15, %v1019_v22, -inf  ;;  %v1024_v29 = vsel %vm1999_vm0, %v1020_v23, -inf  ;;  %vm2283_vm6 = vmmov %vm2282_vm5 }
 0x365   : > { %v1030_v30 = vpop.permute.xlu0 %1029  ;;  %v1025_v40 = vmax.f32 %v993_v32, %v1023_v26  ;;  %v1026_v41 = vmax.f32 %v994_v33, %v1024_v29 }
 0x366   : > { %v1032_v31 = vpop.permute.xlu1 %1031  ;;  %v1033_v36 = vsel %vm734_vm1, %v1028_v15, %v1030_v30 }
 0x367   : > { %v1034_v37 = vsel %vm734_vm1, %v1030_v30, %v1032_v31  ;;  %v1037_v38 = vsel %vm2009_vm7, %v1033_v36, -inf }
 0x368   : > { %v1038_v39 = vsel %vm2013_vm8, %v1034_v37, -inf  ;;  %v1039_v46 = vmax.f32 %v1025_v40, %v1037_v38 }
 0x369   : > { %v1046_v42 = vpop.permute.xlu0 %1045  ;;  %v1040_v47 = vmax.f32 %v1026_v41, %v1038_v39 }
 0x36a   : > { %v1044_v45 = vpop.permute.xlu1 %1043 }
 0x36b   : > { %v1047_v48 = vsel %vm431_vm9, %v1042_v14, %v1044_v45  ;;  %v1048_v50 = vsel %vm431_vm9, %v1044_v45, %v1046_v42 }
 0x36c   : > { %v1051_v51 = vsel %vm2029_vm11, %v1047_v48, -inf  ;;  %v1052_v52 = vsel %vm2033_vm14, %v1048_v50, -inf }
 0x36d   : > { %v1053_v53 = vmax.f32 %v1039_v46, %v1051_v51  ;;  %v1054_v54 = vmax.f32 %v1040_v47, %v1052_v52  ;;  %v1605_v51 = vld [vmem:[%s2255_s4 + $0x4] sm:$0xf]  ;;  %v1611_v52 = vld [vmem:[%s2255_s4 + $0x8] sm:$0xf] }
 0x36e   : > { %1608 = vmatmul.mubr.msk.f32.vlgmr.msra.gmra.mrb[2].mxu0 %vm431_vm9, %v1605_v51 }
 0x36f   : > { %v1144_v55 = vcombine.low %v1053_v53, %v1054_v54  ;;  %1612 = vmatprep.subr.msk.mxu1 %vm2261_vm2, %v1054_v54  ;;  %1418 = vmatprep.mubr.f32.mxu0 %v1803_v0 }
 0x370   : > { %1613 = vmatpush1.msk.msra.mxu1 %vm2261_vm2, %v1053_v53  ;;  %vm2284_vm2 = vcmask 261120  }
 0x371   : > { %1615 = vst.sshfl [vmem:[#allocation2 + $0x2] sm:$0x33 pattern:$0x76325410] %v1144_v55  ;;  %1614 = vmatmul.mubr.msk.f32.vlgmr.msra.gmra.mrb[2].mxu1 %vm431_vm9, %v1611_v52  ;;  %v1435_v55 = vld [vmem:[%s2256_s5] sm:$0xf] }
 0x378   : > { %v1184_v56 = vld [vmem:[#allocation2] sm:$0x3f] }
 0x379   : > { %v1154_v57 = vld [vmem:[#allocation2 + $0x2] sm:$0x3f]  ;;  %v1193_v58 = vrot.slane %v1184_v56, %v1928_v28  ;;  %v1186_v63 = vcombine.high %v1184_v56, %v1184_v56 }
 0x37a   : > { %v1163_v59 = vrot.slane %v1154_v57, %v1928_v28  ;;  %v1156_v60 = vcombine.high %v1154_v57, %v1154_v57 }
 0x37b   : > { %1202 = vrot.lane.b32.xlu0 %v1193_v58, %s1809_s28  ;;  %v1200_v4 = vrot.slane %v1186_v63, %v1928_v28  ;;  %v1201_v5 = vcombine.high %v1193_v58, %v1193_v58 }
 0x37c   : > { %1172 = vrot.lane.b32.xlu1 %v1163_v59, %s1808_s27  ;;  %v1171_v61 = vcombine.high %v1163_v59, %v1163_v59  ;;  %v1170_v62 = vrot.slane %v1156_v60, %v1928_v28 }
 0x37f   : > { %1226 = vrot.lane.b32.xlu0 %v1193_v58, %s1810_s30 }
 0x380   : > { %1214 = vrot.lane.b32.xlu1 %v1163_v59, %s1807_s20 }
 0x383   : > { %1174 = vrot.lane.b32.xlu0 %v1171_v61, %s1808_s27 }
 0x384   : > { %1176 = vrot.lane.b32.xlu1 %v1170_v62, %s1808_s27 }
 0x387   : > { %1206 = vrot.lane.b32.xlu0 %v1200_v4, %s1809_s28 }
 0x388   : > { %1204 = vrot.lane.b32.xlu1 %v1201_v5, %s1809_s28  ;;  %s1727_s28 = sshll.u32 %s1816_s24, 4  ;;  %s1728_s28 = int_to_ptr.vmem [resolvable:$false] %s1727_s28 }
 0x38b   : > { %1216 = vrot.lane.b32.xlu0 %v1171_v61, %s1807_s20 }
 0x38c   : > { %1218 = vrot.lane.b32.xlu1 %v1170_v62, %s1807_s20 }
 0x38f   : > { %1230 = vrot.lane.b32.xlu0 %v1200_v4, %s1810_s30 }
 0x390   : > { %1228 = vrot.lane.b32.xlu1 %v1201_v5, %s1810_s30  ;;  %s1729_s30 = scalar_lea.vmem %s1728_s28, 256 }
 0x3ed   : > { %v1203_v6 = vpop.permute.xlu0 %1202 }
 0x3ee   : > { %v1173_v7 = vpop.permute.xlu1 %1172 }
 0x3f1   : > { %v1227_v8 = vpop.permute.xlu0 %1226 }
 0x3f2   : > { %v1215_v9 = vpop.permute.xlu1 %1214 }
 0x3f5   : > { %v1175_v10 = vpop.permute.xlu0 %1174 }
 0x3f6   : > { %v1177_v11 = vpop.permute.xlu1 %1176  ;;  %v1178_v14 = vsel %vm553_vm3, %v1173_v7, %v1175_v10 }
 0x3f7   : > { %v1179_v15 = vsel %vm553_vm3, %v1175_v10, %v1177_v11  ;;  %v1182_v18 = vmax.f32 %v1053_v53, %v1178_v14  ;;  %vm2285_vm3 = vmmov %vm2284_vm2 }
 0x3f8   : > { %v1183_v19 = vmax.f32 %v1054_v54, %v1179_v15  ;;  %v508_v54 = vpop.f32.mrb[0].mxu1 }
 0x3f9   : > { %v1207_v12 = vpop.permute.xlu0 %1206  ;;  %v510_v0 = vpop.f32.mrb[1].mxu1 }
 0x3fa   : > { %v1205_v13 = vpop.permute.xlu1 %1204 }
 0x3fb   : > { %v1208_v16 = vsel %vm584_vm4, %v1203_v6, %v1205_v13  ;;  %v1209_v17 = vsel %vm584_vm4, %v1205_v13, %v1207_v12 }
 0x3fc   : > { %v1212_v24 = vmax.f32 %v1182_v18, %v1208_v16  ;;  %v1213_v25 = vmax.f32 %v1183_v19, %v1209_v17 }
 0x3fd   : > { %v1217_v20 = vpop.permute.xlu0 %1216 }
 0x3fe   : > { %v1219_v21 = vpop.permute.xlu1 %1218  ;;  %v1220_v22 = vsel %vm2282_vm5, %v1215_v9, %v1217_v20 }
 0x3ff   : > { %v1221_v23 = vsel %vm2283_vm6, %v1217_v20, %v1219_v21  ;;  %v1224_v26 = vmax.f32 %v1212_v24, %v1220_v22 }
 0x400   : > { %v1225_v29 = vmax.f32 %v1213_v25, %v1221_v23 }
 0x401   : > { %v1231_v30 = vpop.permute.xlu0 %1230 }
 0x402   : > { %v1229_v31 = vpop.permute.xlu1 %1228 }
 0x403   : > { %v1232_v32 = vsel %vm2284_vm2, %v1227_v8, %v1229_v31  ;;  %v1233_v33 = vsel %vm2285_vm3, %v1229_v31, %v1231_v30  ;;  %vm2286_vm2 = vcmask 7168  }
 0x404   : > { %v1236_v36 = vmax.f32 %v1224_v26, %v1232_v32  ;;  %v1237_v37 = vmax.f32 %v1225_v29, %v1233_v33  ;;  %vm2287_vm4 = vmmov %vm2286_vm2 }
 0x406   : > { %v1240_v38 = vcombine.low %v1236_v36, %v1237_v37 }
 0x408   : > { %1616 = vst.sshfl [vmem:[#allocation2 + $0x2] sm:$0x33 pattern:$0x76325410] %v1240_v38 }
 0x40f   : > { %v1282_v39 = vld [vmem:[#allocation2] sm:$0x3f] }
 0x410   : > { %v1250_v40 = vld [vmem:[#allocation2 + $0x2] sm:$0x3f]  ;;  %v1291_v41 = vrot.slane %v1282_v39, %v1928_v28  ;;  %v1284_v50 = vcombine.high %v1282_v39, %v1282_v39 }
 0x411   : > { %v1259_v42 = vrot.slane %v1250_v40, %v1928_v28  ;;  %v1252_v45 = vcombine.high %v1250_v40, %v1250_v40 }
 0x412   : > { %1300 = vrot.lane.b32.xlu0 %v1291_v41, %s1811_s8  ;;  %v1299_v48 = vcombine.high %v1291_v41, %v1291_v41  ;;  %v1298_v53 = vrot.slane %v1284_v50, %v1928_v28 }
 0x413   : > { %1268 = vrot.lane.b32.xlu1 %v1259_v42, %s1812_s11  ;;  %v1266_v46 = vrot.slane %v1252_v45, %v1928_v28  ;;  %v1267_v47 = vcombine.high %v1259_v42, %v1259_v42  ;;  %v515_v28 = vcombine.low %v508_v54, %v510_v0 }
 0x416   : > { %1272 = vrot.lane.b32.xlu0 %v1266_v46, %s1812_s11 }
 0x417   : > { %1314 = vrot.lane.b32.xlu1 %v1259_v42, %s1814_s13 }
 0x41a   : > { %1302 = vrot.lane.b32.xlu0 %v1299_v48, %s1811_s8 }
 0x41b   : > { %1270 = vrot.lane.b32.xlu1 %v1267_v47, %s1812_s11 }
 0x41e   : > { %1318 = vrot.lane.b32.xlu0 %v1266_v46, %s1814_s13 }
 0x41f   : > { %1304 = vrot.lane.b32.xlu1 %v1298_v53, %s1811_s8 }
 0x422   : > { %1330 = vrot.lane.b32.xlu0 %v1299_v48, %s1813_s12 }
 0x423   : > { %1316 = vrot.lane.b32.xlu1 %v1267_v47, %s1814_s13 }
 0x426   : > { %1328 = vrot.lane.b32.xlu0 %v1291_v41, %s1813_s12 }
 0x427   : > { %1332 = vrot.lane.b32.xlu1 %v1298_v53, %s1813_s12  ;;  %s293_s12 = sand.u32 1, %s1785_s22  }
 0x428   : > { %s1592_s13 = sshll.u32 %s293_s12, 3  ;;  %s1458_s20 = scalar_lea.sflag [#allocation5], %s293_s12 }
 0x429   : > { %s295_s15 = scalar_lea.vmem [#allocation4], %s1592_s13 }
 0x42a   : > { %s1472_s16 = sshll.u32 %s295_s15, 4  ;;  %s2206_s16 = int_to_ptr.vmem [resolvable:$true] %s1472_s16 }
 0x42b   : > { %1438 = vperm.xlu1 %1698, %v1435_v55   ;;  %s1723_s27 = scalar_lea.vmem %s2206_s16, 128  ;;  %p1730_p1 = scmp.lt.s32.totalorder %s2206_s16, %s1728_s28 }
 0x42c   : > { %p1724_p12 = scmp.ne.s32.totalorder %s2206_s16, %s1723_s27  ;;  %p1731_p2 = scmp.lt.s32.totalorder %s1729_s30, %s1723_s27 }
 0x42e   : > { %p1725_p13 = pnand %p1724_p12, %p1892_p4  ;;  %p1732_p3 = por %p1731_p2, %p1730_p1 }
 0x430   : > { %p1726_p0 = pneg %p1725_p13 }
 0x432   : > { %p1733_p5 = pnand %p1732_p3, %p1726_p0 }
 0x441   : > { %v846_v29 = vpop.f32.mrb[2].mxu0 }
 0x442   : > { %v848_v30 = vpop.f32.mrb[3].mxu0 }
 0x443   : > { %v853_v31 = vcombine.low %v846_v29, %v848_v30 }
 0x444   : > { %v1133_v3 = vpop.f32.mrb[2].mxu1 }
 0x445   : > { %v1135_v32 = vpop.f32.mrb[3].mxu1  ;;  %v855_v33 = vadd.f32 %v853_v31, %v515_v28 }
 0x446   : > { %v1140_v1 = vcombine.low %v1133_v3, %v1135_v32 }
 0x484   : > { %v1301_v56 = vpop.permute.xlu0 %1300 }
 0x485   : > { %v1269_v57 = vpop.permute.xlu1 %1268 }
 0x488   : > { %v1273_v59 = vpop.permute.xlu0 %1272 }
 0x489   : > { %v1315_v58 = vpop.permute.xlu1 %1314 }
 0x48c   : > { %v1303_v61 = vpop.permute.xlu0 %1302 }
 0x48d   : > { %v1271_v60 = vpop.permute.xlu1 %1270  ;;  %v1306_v10 = vsel %vm2287_vm4, %v1301_v56, %v1303_v61 }
 0x48e   : > { %v1274_v62 = vsel %vm664_vm10, %v1269_v57, %v1271_v60  ;;  %v1275_v63 = vsel %vm664_vm10, %v1271_v60, %v1273_v59  ;;  %v1310_v16 = vsel %vm1995_vm15, %v1306_v10, -inf  ;;  %vm2288_vm10 = vcmask 1041408  }
 0x48f   : > { %v1278_v4 = vsel %vm1984_vm12, %v1274_v62, -inf  ;;  %v1279_v8 = vsel %vm1988_vm13, %v1275_v63, -inf  ;;  %vm2289_vm12 = vmmov %vm2288_vm10 }
 0x490   : > { %v1319_v6 = vpop.permute.xlu0 %1318  ;;  %v1280_v9 = vmax.f32 %v1236_v36, %v1278_v4  ;;  %v1281_v14 = vmax.f32 %v1237_v37, %v1279_v8  ;;  %v1142_v36 = vadd.f32 %v1140_v1, %v855_v33  ;;  %v1815_v37 = vmov 839922192  }
 0x491   : > { %v1305_v5 = vpop.permute.xlu1 %1304  ;;  %v1441_v38 = vunpack.c.l.s4 %v1815_v37 }
 0x492   : > { %v1307_v7 = vsel %vm2286_vm2, %v1303_v61, %v1305_v5  ;;  %v1312_v18 = vmax.f32 %v1280_v9, %v1310_v16 }
 0x493   : > { %v1311_v11 = vsel %vm1999_vm0, %v1307_v7, -inf  ;;  %v1442_v39 = vunpack.c.0.s8 %v1441_v38 }
 0x494   : > { %v1331_v13 = vpop.permute.xlu0 %1330  ;;  %v1313_v19 = vmax.f32 %v1281_v14, %v1311_v11 }
 0x495   : > { %v1317_v12 = vpop.permute.xlu1 %1316  ;;  %v1445_v40 = vsub.s32 %v1442_v39, %v1925_v27 }
 0x496   : > { %v1320_v15 = vsel %vm734_vm1, %v1315_v58, %v1317_v12  ;;  %v1321_v34 = vsel %vm734_vm1, %v1317_v12, %v1319_v6 }
 0x497   : > { %v1324_v35 = vsel %vm2009_vm7, %v1320_v15, -inf  ;;  %v1325_v17 = vsel %vm2013_vm8, %v1321_v34, -inf }
 0x498   : > { %v1329_v20 = vpop.permute.xlu0 %1328  ;;  %v1326_v21 = vmax.f32 %v1312_v18, %v1324_v35  ;;  %v1327_v22 = vmax.f32 %v1313_v19, %v1325_v17 }
 0x499   : > { %v1333_v44 = vpop.permute.xlu1 %1332  ;;  %v1334_v24 = vsel %vm431_vm9, %v1329_v20, %v1331_v13 }
 0x49a   : > { %v1335_v23 = vsel %vm431_vm9, %v1331_v13, %v1333_v44  ;;  %v1338_v2 = vsel %vm2029_vm11, %v1334_v24, -inf }
 0x49b   : > { %v1339_v43 = vsel %vm2033_vm14, %v1335_v23, -inf  ;;  %v1340_v26 = vmax.f32 %v1326_v21, %v1338_v2 }
 0x49c   : > { %v1341_v25 = vmax.f32 %v1327_v22, %v1339_v43 }
 0x49e   : > { %1618 = vmatprep.subr.msk.mxu0 %vm2288_vm10, %v1341_v25 }
 0x49f   : > { %1619 = vmatpush1.msk.msra.mxu0 %vm2289_vm12, %v1340_v26 }
 0x4a0   : > { %1620 = vmatmul.mubr.msk.f32.vlgmr.msra.gmra.mrb[4].mxu0 %vm431_vm9, %v1617_v49 }
 0x4aa   : > { %v1439_v41 = vpop.permute.xlu1 %1438 }
 0x4ab   : > { %v1446_v47 = vrot.slane %v1439_v41, %v1445_v40 }
 0x573   : > { %v1420_v42 = vpop.f32.mrb[4].mxu0 }
 0x574   : > { %v1422_v45 = vpop.f32.mrb[5].mxu0 }
 0x575   : > { %v1427_v46 = vcombine.low %v1420_v42, %v1422_v45 }
 0x577   : > { %v1429_v48 = vadd.f32 %v1427_v46, %v1142_v36 }
 0x579   : > { %v1448_v50 = vadd.f32 %v1446_v47, %v1429_v48 }
 0x57b   : > { %v1621_v51 = vmul.f32 -1.442695, %v1448_v50 }
 0x57d   : > { %1719 = vpow2.f32 %v1621_v51 }
 0x587   : > { %v1720_v52 = vpop.eup %1719 }
 0x588   : > { %v1452_v53 = vadd.f32 1.0, %v1720_v52 }
 0x58a   : > { %1721 = vrcp.f32 %v1452_v53 }
 0x594   : > { %v1722_v54 = vpop.eup %1721 }
 0x595   : > { %v1455_v27 = vmul.f32 %v1722_v54, %v1448_v50 }
 0x597   : > { %1456 = vst [vmem:[%s295_s15] sm:$0xff] %v1455_v27 }
 0x598   : > { %1736 = shalt.err (!%p1733_p5)
}
 0x599   : > { %s1737_s8 = scalar_lea.hbm %s2204_s19, 128  ;;  %s1741_s13 = scalar_lea.hbm %s2257_s6, 256 }
 0x59a   : > { %p1738_p6 = scmp.ne.s32.totalorder %s2204_s19, %s1737_s8  ;;  %p1742_p10 = scmp.lt.u32.totalorder %s2204_s19, %s2257_s6 }
 0x59b   : > { %p1743_p11 = scmp.lt.u32.totalorder %s1741_s13, %s1737_s8  ;;  %p1745_p13 = scmp.lt.u32.totalorder %s1737_s8, %s2204_s19 }
 0x59c   : > { %p1739_p7 = pnand %p1738_p6, %p1892_p4 }
 0x59d   : > { %p1744_p12 = por %p1743_p11, %p1742_p10 }
 0x59e   : > { %p1740_p9 = pneg %p1739_p7 }
 0x59f   : > { %p1746_p0 = por %p1745_p13, %p1744_p12 }
 0x5a1   : > { %p1747_p1 = pnand %p1746_p0, %p1740_p9 }
 0x5a3   : > { %1750 = shalt.err (!%p1747_p1)
}
 0x5a4   : > { %1629 = dma.vmem_to_hbm [thread:$0]  (%p1892_p4), %s2206_s16, 128, %s2204_s19, %s1458_s20  }
 0x5a5 PF: > { %p1635_p2 = scmp.ge.s32.totalorder %s1801_s26, 2  ;;  %s1484_s17 = sand.u32 1, %s1781_s21  }
 0x5a6   : > { %s1485_s18 = scalar_lea.sflag [#allocation5], %s1484_s17 }
 0x5a7   : > { %p1632_p3 = pnand %p1635_p2, %p1899_p8 }
 0x5a9   : > { %1776 = dma.done.wait (!%p1632_p3), %s1485_s18, 128  }
 0x5aa   : > { %1778 = vsyncadd (!%p1632_p3), %s1485_s18, 4294967168  ;;  %s19_s26 = sadd.s32 1, %s1801_s26   ;;  %s2290_s21 = smov %s1785_s22 }
 0x5ab   : > { %p16_p5 = scmp.ge.s32.totalorder %s19_s26, 4   ;;  %s2291_s22 = smov %s1789_s23 }
 0x5ac   : > { %s2292_s23 = smov %s1905_s10  ;;  %s2293_s24 = smov %s1797_s25 }
 0x5ad   : > { %s2294_s25 = smov %s2296_s29  ;;  %18 = sbr.rel (!%p16_p5) target bundleno = 4 (0x4), region = 99 }
 0x5b4   :  { %1490 = vsyncpa [#allocation5], 1 }
 0x5b5   :  { %1492 = vsyncpa [#allocation5 + $0x1], 1 }

// kernel: tpu_custom_call.1
= control target key start
LH: loop header
LB: loop body
LE: loop exit
PB: predicated region body
PF: predicated region fallthrough
CT: control target
= control target key end

     0   :  { %11 = vsyncpa [#allocation5], 0  ;;  %s2251_s0 = inlined_call_operand.vmem [shape: s32[1,256], index: 0, kind: input, shape index: {}]   ;;  %s2252_s1 = inlined_call_operand.vmem [shape: f32[2,4,256], index: 1, kind: input, shape index: {}]   ;;  %s2253_s2 = inlined_call_operand.vmem [shape: f32[2,4], index: 2, kind: input, shape index: {}]   ;;  %s2254_s3 = inlined_call_operand.vmem [shape: f32[2,1], index: 3, kind: input, shape index: {}]   ;;  %s2255_s4 = inlined_call_operand.vmem [shape: f32[4,4,2], index: 4, kind: input, shape index: {}]   ;;  %s2256_s5 = inlined_call_operand.vmem [shape: f32[4,1], index: 5, kind: input, shape index: {}]   ;;  %s2257_s6 = inlined_call_operand.hbm [shape: f32[2,4,256], index: 6, kind: output, shape index: {}]  }
   0x1   :  { %13 = vsyncpa [#allocation5 + $0x1], 0  ;;  %s1852_s21 = smov 0   ;;  %s1854_s22 = smov 0  }
   0x2   :  { %s1856_s23 = smov 0   ;;  %s1858_s24 = smov 0  }
   0x3   :  { %s1860_s25 = smov 0   ;;  %s1862_s26 = smov 0  }
   0x4 LB: > { %s1584_s27 = sadd.s32 4294967295, %s1801_s26   ;;  %s1585_s28 = sadd.s32 4294967294, %s1801_s26   ;;  %s1801_s26 = sphi %s1862_s26, %s19_s26   ;;  %s1797_s25 = sphi %s1860_s25, %s2294_s25   ;;  %s1793_s24 = sphi %s1858_s24, %s2293_s24   ;;  %s1789_s23 = sphi %s1856_s23, %s2292_s23   ;;  %s1785_s22 = sphi %s1854_s22, %s2291_s22   ;;  %s1781_s21 = sphi %s1852_s21, %s2290_s21  }
   0x5   : > { %s31_s29 = sadd.s32 1, %s1797_s25  ;;  %s184_s30 = sadd.s32 1, %s1789_s23 }
   0x6   : > { %p33_p0 = scmp.ge.s32.totalorder %s31_s29, 2  ;;  %p194_p1 = scmp.ne.s32.totalorder %s1789_s23, %s1785_s22 }
   0x7   : > { %p195_p2 = scmp.eq.s32.totalorder %s1584_s27, 1  ;;  %p200_p3 = scmp.ne.s32.totalorder %s1785_s22, %s1781_s21 }
   0x8   : > { %s2296_s29 = smov (%p33_p0, %s31_s29), 0  ;;  %p201_p5 = scmp.eq.s32.totalorder %s1585_s28, 1 }
   0x9   : > { %p1892_p4 = por %p195_p2, %p194_p1  ;;  %s181_s8 = ssub.s32 %s1797_s25, %s2296_s29 }
   0xa   : > { %p1591_p6 = scmp.ge.s32.totalorder %s1801_s26, 1  ;;  %p182_p7 = scmp.eq.s32.totalorder %s181_s8, 0 }
   0xb   : > { %p1899_p8 = por %p201_p5, %p200_p3  ;;  %p254_p9 = scmp.lt.s32.totalorder %s1801_s26, 3 }
   0xc   : > { %s1905_s10 = scalar_select %p182_p7, %s1789_s23, %s184_s30  }
   0xd   : > { %p255_p10 = pnand %p1591_p6, %p254_p9 }
   0xe   : > { %p296_p11 = scmp.lt.s32.totalorder (!%p255_p10), %s1793_s24, 1  ;;  %v1803_v0 = vmov (!%p255_p10), 0.0   ;;  %v327_v1 = vld [vmem:[%s2254_s3] sm:$0x3] (!%p255_p10)  ;;  %v1804_v2 = vmov (!%p255_p10), 0   ;;  %vm339_vm0 = vcmask (!%p255_p10), 1043456   ;;  %v535_v24 = vlaneseq (!%p255_p10) }
   0xf   : > { %258 = sbr.rel (%p255_p10) target bundleno = 1445 (0x5a5), region = 44  ;;  %408 = vmatprep.mubr.f32.mxu0 (!%p255_p10), %v1803_v0  ;;  %506 = vmatprep.mubr.f32.mxu1 (!%p255_p10), %v1803_v0  ;;  %v325_v5 = vld [vmem:[%s2253_s2] sm:$0x3] (!%p255_p10)  ;;  %vm335_vm1 = vcmask (!%p255_p10), 31744   ;;  %v1805_v6 = vmov (!%p255_p10), -inf   ;;  %vm2261_vm2 = vcmask (!%p255_p10), 1041408  }
  0x10   : > { %1697 = vset.pattern.permute.xlu0 (!%p255_p10), %v1804_v2  ;;  %1698 = vset.pattern.permute.xlu1 (!%p255_p10), %v1804_v2  ;;  %318 = vst [vmem:[#allocation2 + $0x6] sm:$0x3] (!%p255_p10), %v1805_v6  ;;  %317 = vst [vmem:[#allocation2] sm:$0x3] (!%p255_p10), %v1805_v6  ;;  %v1806_v22 = vmov (!%p255_p10), 1983009808  }
  0x11   : > { %330 = vperm.xlu0 (!%p255_p10), %1697, %v327_v1   ;;  %v533_v23 = vunpack.c.l.s4 (!%p255_p10), %v1806_v22  ;;  %v1925_v27 = vshrl.u32 (!%p255_p10), %v535_v24, 7  ;;  %s1807_s20 = smov (!%p255_p10), 96   ;;  %s1808_s27 = smov (!%p255_p10), 112   ;;  %vm553_vm3 = vcmask (!%p255_p10), 916480   ;;  %vm584_vm4 = vcmask (!%p255_p10), 130048  }
  0x12   : > { %s1809_s28 = smov (!%p255_p10), 16   ;;  %s1810_s30 = smov (!%p255_p10), 32   ;;  %vm2260_vm5 = vcmask (!%p255_p10), 785408   ;;  %vm2259_vm6 = vcmask (!%p255_p10), 261120   ;;  %vm664_vm10 = vcmask (!%p255_p10), 1039360   ;;  %vm2258_vm14 = vcmask (!%p255_p10), 7168  }
  0x13   : > { %v534_v26 = vunpack.c.0.s8 (!%p255_p10), %v533_v23  ;;  %s1811_s8 = smov (!%p255_p10), 1   ;;  %s1812_s11 = smov (!%p255_p10), 127  }
  0x14   : > { %s1813_s12 = smov (!%p255_p10), 2  }
  0x15   : > { %v1928_v28 = vsub.s32 (!%p255_p10), %v534_v26, %v1925_v27 }
  0x16   : > { %s297_s13 = scalar_select %p296_p11, %s1793_s24, 1 }
  0x18   : > { %s1627_s14 = sshll.u32 %s297_s13, 3  ;;  %s1814_s13 = smov 126  }
  0x19   : > { %s300_s17 = scalar_lea.vmem %s2252_s1, %s1627_s14  ;;  %s1628_s14 = sshll.u32 %s1793_s24, 7 }
  0x1a   : > { %v326_v3 = vld [vmem:[%s300_s17] sm:$0xff]  ;;  %s2204_s19 = scalar_lea.hbm %s2257_s6, %s1628_s14  ;;  %s1816_s24 = smov [#allocation4]  }
  0x1b   : > { %v334_v4 = vcombine.high %v326_v3, %v326_v3 }
  0x1d   : > { %1595 = vmatprep.subr.msk.mxu0 %vm339_vm0, %v334_v4 }
  0x1e   : > { %1596 = vmatpush1.msk.msra.mxu0 %vm339_vm0, %v326_v3 }
  0x1f   : > { %1597 = vmatmul.mubr.msk.f32.vlgmr.msra.gmra.mrb[0].mxu0 %vm335_vm1, %v325_v5  ;;  %vm734_vm1 = vcmask 1031168  }
  0x20   : > { %844 = vmatprep.mubr.f32.mxu0 %v1803_v0 }
  0x90   : > { %v331_v7 = vpop.permute.xlu0 %330 }
  0xf2   : > { %v410_v8 = vpop.f32.mrb[0].mxu0 }
  0xf3   : > { %v411_v9 = vadd.f32 %v410_v8, %v331_v7  ;;  %v412_v10 = vpop.f32.mrb[1].mxu0 }
  0xf4   : > { %v413_v11 = vadd.f32 %v412_v10, %v331_v7 }
  0xf5   : > { %v1598_v12 = vmul.f32 -1.442695, %v411_v9 }
  0xf6   : > { %v1599_v13 = vmul.f32 -1.442695, %v413_v11 }
  0xf7   : > { %1711 = vpow2.f32 %v1598_v12 }
  0xf8   : > { %1713 = vpow2.f32 %v1599_v13 }
 0x101   : > { %v1712_v14 = vpop.eup %1711 }
 0x102   : > { %v1714_v15 = vpop.eup %1713  ;;  %v421_v16 = vadd.f32 1.0, %v1712_v14 }
 0x103   : > { %v422_v17 = vadd.f32 1.0, %v1714_v15 }
 0x104   : > { %1715 = vrcp.f32 %v421_v16  ;;  %v320_v16 = vld [vmem:[%s2251_s0] sm:$0x3] }
 0x105   : > { %1717 = vrcp.f32 %v422_v17  ;;  %vm321_vm7 = vcmp.lt.s32.totalorder %v320_v16, 15  ;;  %vm323_vm8 = vcmp.ge.s32.totalorder %v320_v16, 1  ;;  %vm322_vm9 = vcmp.lt.s32.totalorder %v320_v16, 14 }
 0x106   : > { %v674_v26 = vsel %vm323_vm8, 1, %v1804_v2  ;;  %vm324_vm11 = vcmp.ge.s32.totalorder %v320_v16, 2 }
 0x10e   : > { %v1716_v18 = vpop.eup %1715 }
 0x10f   : > { %v1718_v19 = vpop.eup %1717  ;;  %v427_v20 = vmul.f32 %v1716_v18, %v411_v9 }
 0x110   : > { %v428_v21 = vmul.f32 %v1718_v19, %v413_v11  ;;  %v633_v19 = vsub.s32 0, %v1925_v27 }
 0x112   : > { %v519_v25 = vcombine.low %v427_v20, %v428_v21  ;;  %1600 = vmatprep.subr.msk.mxu1 %vm2261_vm2, %v428_v21 }
 0x113   : > { %1601 = vmatpush1.msk.msra.mxu1 %vm2261_vm2, %v427_v20 }
 0x114   : > { %1603 = vst.sshfl [vmem:[#allocation2 + $0x2] sm:$0x33 pattern:$0x76325410] %v519_v25 }
 0x11b   : > { %v529_v29 = vld [vmem:[#allocation2 + $0x2] sm:$0x3f] }
 0x11c   : > { %v538_v30 = vrot.slane %v529_v29, %v1928_v28  ;;  %v560_v31 = vld [vmem:[#allocation2] sm:$0x3f]  ;;  %v531_v34 = vcombine.high %v529_v29, %v529_v29 }
 0x11d   : > { %v569_v32 = vrot.slane %v560_v31, %v1928_v28  ;;  %v562_v36 = vcombine.high %v560_v31, %v560_v31  ;;  %v717_v31 = vsel %vm322_vm9, 1, %v1804_v2  ;;  %vm431_vm9 = vcmask 15360  }
 0x11e   : > { %591 = vrot.lane.b32.xlu1 %v538_v30, %s1807_s20  ;;  %547 = vrot.lane.b32.xlu0 %v538_v30, %s1808_s27  ;;  %v546_v33 = vcombine.high %v538_v30, %v538_v30  ;;  %v545_v35 = vrot.slane %v531_v34, %v1928_v28 }
 0x11f   : > { %v576_v37 = vrot.slane %v562_v36, %v1928_v28  ;;  %v577_v38 = vcombine.high %v569_v32, %v569_v32 }
 0x122   : > { %578 = vrot.lane.b32.xlu0 %v569_v32, %s1809_s28  ;;  %549 = vrot.lane.b32.xlu1 %v546_v33, %s1808_s27 }
 0x126   : > { %604 = vrot.lane.b32.xlu0 %v569_v32, %s1810_s30  ;;  %551 = vrot.lane.b32.xlu1 %v545_v35, %s1808_s27  ;;  %v678_v32 = vrot.slane %v674_v26, %v633_v19 }
 0x128   : > { %vm1995_vm15 = vcmp.eq.s32.totalorder %v678_v32, 1 }
 0x12a   : > { %582 = vrot.lane.b32.xlu0 %v576_v37, %s1809_s28  ;;  %580 = vrot.lane.b32.xlu1 %v577_v38, %s1809_s28 }
 0x12e   : > { %593 = vrot.lane.b32.xlu0 %v546_v33, %s1807_s20  ;;  %595 = vrot.lane.b32.xlu1 %v545_v35, %s1807_s20 }
 0x132   : > { %608 = vrot.lane.b32.xlu0 %v576_v37, %s1810_s30  ;;  %606 = vrot.lane.b32.xlu1 %v577_v38, %s1810_s30  ;;  %v721_v38 = vrot.slane %v717_v31, %v633_v19 }
 0x190   : > { %v592_v39 = vpop.permute.xlu1 %591  ;;  %v548_v40 = vpop.permute.xlu0 %547 }
 0x194   : > { %v579_v41 = vpop.permute.xlu0 %578  ;;  %v550_v42 = vpop.permute.xlu1 %549 }
 0x195   : > { %v554_v47 = vsel %vm553_vm3, %v548_v40, %v550_v42 }
 0x196   : > { %v558_v51 = vmax.f32 %v427_v20, %v554_v47  ;;  %v637_v20 = vsub.s32 1, %v1925_v27 }
 0x198   : > { %v605_v43 = vpop.permute.xlu0 %604  ;;  %v552_v44 = vpop.permute.xlu1 %551  ;;  %v682_v33 = vrot.slane %v674_v26, %v637_v20 }
 0x199   : > { %v555_v48 = vsel %vm553_vm3, %v550_v42, %v552_v44  ;;  %v743_v42 = vsel %vm324_vm11, 1, %v1804_v2 }
 0x19a   : > { %v559_v52 = vmax.f32 %v428_v21, %v555_v48  ;;  %v630_v21 = vsel %vm321_vm7, 1, %v1804_v2  ;;  %vm1999_vm0 = vcmp.eq.s32.totalorder %v682_v33, 1  ;;  %vm2009_vm7 = vcmp.eq.s32.totalorder %v721_v38, 1 }
 0x19b   : > { %v634_v24 = vrot.slane %v630_v21, %v633_v19  ;;  %v638_v25 = vrot.slane %v630_v21, %v637_v20 }
 0x19c   : > { %v583_v45 = vpop.permute.xlu0 %582  ;;  %v581_v46 = vpop.permute.xlu1 %580 }
 0x19d   : > { %v585_v49 = vsel %vm584_vm4, %v579_v41, %v581_v46  ;;  %v586_v50 = vsel %vm584_vm4, %v581_v46, %v583_v45  ;;  %vm1984_vm12 = vcmp.eq.s32.totalorder %v634_v24, 1  ;;  %vm1988_vm13 = vcmp.eq.s32.totalorder %v638_v25, 1 }
 0x19e   : > { %v589_v57 = vmax.f32 %v558_v51, %v585_v49  ;;  %v590_v58 = vmax.f32 %v559_v52, %v586_v50  ;;  %v747_v50 = vrot.slane %v743_v42, %v633_v19  ;;  %v751_v51 = vrot.slane %v743_v42, %v637_v20  ;;  %v1617_v49 = vld [vmem:[%s2255_s4 + $0xc] sm:$0xf] }
 0x1a0   : > { %v594_v53 = vpop.permute.xlu0 %593  ;;  %v596_v54 = vpop.permute.xlu1 %595  ;;  %vm2029_vm11 = vcmp.eq.s32.totalorder %v747_v50, 1 }
 0x1a1   : > { %v598_v55 = vsel %vm2260_vm5, %v592_v39, %v594_v53  ;;  %v599_v56 = vsel %vm2260_vm5, %v594_v53, %v596_v54  ;;  %v725_v39 = vrot.slane %v717_v31, %v637_v20 }
 0x1a2   : > { %v602_v59 = vmax.f32 %v589_v57, %v598_v55  ;;  %v603_v60 = vmax.f32 %v590_v58, %v599_v56 }
 0x1a3   : > { %vm2013_vm8 = vcmp.eq.s32.totalorder %v725_v39, 1 }
 0x1a4   : > { %v609_v61 = vpop.permute.xlu0 %608  ;;  %v607_v62 = vpop.permute.xlu1 %606 }
 0x1a5   : > { %v611_v63 = vsel %vm2259_vm6, %v605_v43, %v607_v62  ;;  %v612_v1 = vsel %vm2259_vm6, %v607_v62, %v609_v61 }
 0x1a6   : > { %v1954_v3 = vmax.f32 %v602_v59, %v611_v63  ;;  %v1956_v4 = vmax.f32 %v603_v60, %v612_v1 }
 0x1a8   : > { %v619_v5 = vcombine.low %v1954_v3, %v1956_v4 }
 0x1aa   : > { %1604 = vst.sshfl [vmem:[#allocation2 + $0x2] sm:$0x33 pattern:$0x76325410] %v619_v5 }
 0x1b1   : > { %v673_v6 = vld [vmem:[#allocation2] sm:$0x3f] }
 0x1b2   : > { %v629_v7 = vld [vmem:[#allocation2 + $0x2] sm:$0x3f]  ;;  %v693_v8 = vrot.slane %v673_v6, %v1928_v28  ;;  %v686_v13 = vcombine.high %v673_v6, %v673_v6 }
 0x1b3   : > { %v649_v9 = vrot.slane %v629_v7, %v1928_v28  ;;  %v642_v10 = vcombine.high %v629_v7, %v629_v7 }
 0x1b4   : > { %702 = vrot.lane.b32.xlu0 %v693_v8, %s1811_s8  ;;  %v700_v14 = vrot.slane %v686_v13, %v1928_v28  ;;  %v701_v15 = vcombine.high %v693_v8, %v693_v8 }
 0x1b5   : > { %658 = vrot.lane.b32.xlu1 %v649_v9, %s1812_s11  ;;  %v657_v11 = vcombine.high %v649_v9, %v649_v9  ;;  %v656_v12 = vrot.slane %v642_v10, %v1928_v28 }
 0x1b8   : > { %754 = vrot.lane.b32.xlu0 %v693_v8, %s1813_s12 }
 0x1b9   : > { %728 = vrot.lane.b32.xlu1 %v649_v9, %s1814_s13 }
 0x1bc   : > { %660 = vrot.lane.b32.xlu0 %v657_v11, %s1812_s11 }
 0x1bd   : > { %662 = vrot.lane.b32.xlu1 %v656_v12, %s1812_s11 }
 0x1c0   : > { %706 = vrot.lane.b32.xlu0 %v700_v14, %s1811_s8 }
 0x1c1   : > { %704 = vrot.lane.b32.xlu1 %v701_v15, %s1811_s8 }
 0x1c4   : > { %730 = vrot.lane.b32.xlu0 %v657_v11, %s1814_s13 }
 0x1c5   : > { %732 = vrot.lane.b32.xlu1 %v656_v12, %s1814_s13 }
 0x1c8   : > { %758 = vrot.lane.b32.xlu0 %v700_v14, %s1813_s12 }
 0x1c9   : > { %756 = vrot.lane.b32.xlu1 %v701_v15, %s1813_s12 }
 0x226   : > { %v703_v17 = vpop.permute.xlu0 %702 }
 0x227   : > { %v659_v18 = vpop.permute.xlu1 %658 }
 0x22a   : > { %v755_v22 = vpop.permute.xlu0 %754 }
 0x22b   : > { %v729_v23 = vpop.permute.xlu1 %728 }
 0x22e   : > { %v661_v29 = vpop.permute.xlu0 %660 }
 0x22f   : > { %v663_v30 = vpop.permute.xlu1 %662  ;;  %v665_v36 = vsel %vm664_vm10, %v659_v18, %v661_v29 }
 0x230   : > { %v666_v37 = vsel %vm664_vm10, %v661_v29, %v663_v30  ;;  %v669_v47 = vsel %vm1984_vm12, %v665_v36, -inf }
 0x231   : > { %v670_v48 = vsel %vm1988_vm13, %v666_v37, -inf  ;;  %v671_v56 = vmax.f32 %v1954_v3, %v669_v47 }
 0x232   : > { %v707_v40 = vpop.permute.xlu0 %706  ;;  %v672_v57 = vmax.f32 %v1956_v4, %v670_v48 }
 0x233   : > { %v705_v41 = vpop.permute.xlu1 %704 }
 0x234   : > { %v709_v45 = vsel %vm2258_vm14, %v703_v17, %v705_v41  ;;  %v710_v46 = vsel %vm2258_vm14, %v705_v41, %v707_v40  ;;  %vm2033_vm14 = vcmp.eq.s32.totalorder %v751_v51, 1 }
 0x235   : > { %v713_v52 = vsel %vm1995_vm15, %v709_v45, -inf  ;;  %v714_v53 = vsel %vm1999_vm0, %v710_v46, -inf }
 0x236   : > { %v731_v54 = vpop.permute.xlu0 %730  ;;  %v715_v62 = vmax.f32 %v671_v56, %v713_v52  ;;  %v716_v63 = vmax.f32 %v672_v57, %v714_v53 }
 0x237   : > { %v733_v55 = vpop.permute.xlu1 %732  ;;  %v735_v58 = vsel %vm734_vm1, %v729_v23, %v731_v54 }
 0x238   : > { %v736_v59 = vsel %vm734_vm1, %v731_v54, %v733_v55  ;;  %v739_v60 = vsel %vm2009_vm7, %v735_v58, -inf }
 0x239   : > { %v740_v61 = vsel %vm2013_vm8, %v736_v59, -inf  ;;  %v741_v6 = vmax.f32 %v715_v62, %v739_v60 }
 0x23a   : > { %v759_v4 = vpop.permute.xlu0 %758  ;;  %v742_v7 = vmax.f32 %v716_v63, %v740_v61 }
 0x23b   : > { %v757_v5 = vpop.permute.xlu1 %756 }
 0x23c   : > { %v760_v8 = vsel %vm431_vm9, %v755_v22, %v757_v5  ;;  %v761_v9 = vsel %vm431_vm9, %v757_v5, %v759_v4 }
 0x23d   : > { %v764_v10 = vsel %vm2029_vm11, %v760_v8, -inf  ;;  %v765_v11 = vsel %vm2033_vm14, %v761_v9, -inf }
 0x23e   : > { %v766_v12 = vmax.f32 %v741_v6, %v764_v10  ;;  %v767_v13 = vmax.f32 %v742_v7, %v765_v11  ;;  %v430_v11 = vld [vmem:[%s2255_s4] sm:$0xf] }
 0x23f   : > { %1602 = vmatmul.mubr.msk.f32.vlgmr.msra.gmra.mrb[0].mxu1 %vm431_vm9, %v430_v11 }
 0x240   : > { %v857_v14 = vcombine.low %v766_v12, %v767_v13  ;;  %1606 = vmatprep.subr.msk.mxu0 %vm2261_vm2, %v767_v13  ;;  %1131 = vmatprep.mubr.f32.mxu1 %v1803_v0 }
 0x241   : > { %1607 = vmatpush1.msk.msra.mxu0 %vm2261_vm2, %v766_v12 }
 0x242   : > { %1609 = vst.sshfl [vmem:[#allocation2 + $0x2] sm:$0x33 pattern:$0x76325410] %v857_v14 }
 0x249   : > { %v897_v15 = vld [vmem:[#allocation2] sm:$0x3f] }
 0x24a   : > { %v867_v16 = vld [vmem:[#allocation2 + $0x2] sm:$0x3f]  ;;  %v906_v17 = vrot.slane %v897_v15, %v1928_v28  ;;  %v899_v22 = vcombine.high %v897_v15, %v897_v15 }
 0x24b   : > { %v876_v18 = vrot.slane %v867_v16, %v1928_v28  ;;  %v869_v19 = vcombine.high %v867_v16, %v867_v16 }
 0x24c   : > { %915 = vrot.lane.b32.xlu0 %v906_v17, %s1809_s28  ;;  %v913_v23 = vrot.slane %v899_v22, %v1928_v28  ;;  %v914_v24 = vcombine.high %v906_v17, %v906_v17 }
 0x24d   : > { %885 = vrot.lane.b32.xlu1 %v876_v18, %s1808_s27  ;;  %v884_v20 = vcombine.high %v876_v18, %v876_v18  ;;  %v883_v21 = vrot.slane %v869_v19, %v1928_v28 }
 0x250   : > { %939 = vrot.lane.b32.xlu0 %v906_v17, %s1810_s30 }
 0x251   : > { %927 = vrot.lane.b32.xlu1 %v876_v18, %s1807_s20 }
 0x254   : > { %887 = vrot.lane.b32.xlu0 %v884_v20, %s1808_s27 }
 0x255   : > { %889 = vrot.lane.b32.xlu1 %v883_v21, %s1808_s27 }
 0x258   : > { %919 = vrot.lane.b32.xlu0 %v913_v23, %s1809_s28 }
 0x259   : > { %917 = vrot.lane.b32.xlu1 %v914_v24, %s1809_s28 }
 0x25c   : > { %929 = vrot.lane.b32.xlu0 %v884_v20, %s1807_s20 }
 0x25d   : > { %931 = vrot.lane.b32.xlu1 %v883_v21, %s1807_s20 }
 0x260   : > { %943 = vrot.lane.b32.xlu0 %v913_v23, %s1810_s30 }
 0x261   : > { %941 = vrot.lane.b32.xlu1 %v914_v24, %s1810_s30 }
 0x2be   : > { %v916_v25 = vpop.permute.xlu0 %915 }
 0x2bf   : > { %v886_v26 = vpop.permute.xlu1 %885 }
 0x2c2   : > { %v940_v29 = vpop.permute.xlu0 %939 }
 0x2c3   : > { %v928_v30 = vpop.permute.xlu1 %927 }
 0x2c6   : > { %v888_v31 = vpop.permute.xlu0 %887 }
 0x2c7   : > { %v890_v32 = vpop.permute.xlu1 %889  ;;  %v891_v37 = vsel %vm553_vm3, %v886_v26, %v888_v31 }
 0x2c8   : > { %v892_v38 = vsel %vm553_vm3, %v888_v31, %v890_v32  ;;  %v895_v41 = vmax.f32 %v766_v12, %v891_v37 }
 0x2c9   : > { %v896_v42 = vmax.f32 %v767_v13, %v892_v38 }
 0x2ca   : > { %v920_v33 = vpop.permute.xlu0 %919 }
 0x2cb   : > { %v918_v36 = vpop.permute.xlu1 %917 }
 0x2cc   : > { %v921_v39 = vsel %vm584_vm4, %v916_v25, %v918_v36  ;;  %v922_v40 = vsel %vm584_vm4, %v918_v36, %v920_v33 }
 0x2cd   : > { %v925_v50 = vmax.f32 %v895_v41, %v921_v39  ;;  %v926_v51 = vmax.f32 %v896_v42, %v922_v40 }
 0x2ce   : > { %v930_v45 = vpop.permute.xlu0 %929 }
 0x2cf   : > { %v932_v46 = vpop.permute.xlu1 %931  ;;  %v933_v47 = vsel %vm2260_vm5, %v928_v30, %v930_v45 }
 0x2d0   : > { %v934_v48 = vsel %vm2260_vm5, %v930_v45, %v932_v46  ;;  %v937_v52 = vmax.f32 %v925_v50, %v933_v47 }
 0x2d1   : > { %v938_v53 = vmax.f32 %v926_v51, %v934_v48 }
 0x2d2   : > { %v944_v54 = vpop.permute.xlu0 %943 }
 0x2d3   : > { %v942_v55 = vpop.permute.xlu1 %941 }
 0x2d4   : > { %v945_v56 = vsel %vm2259_vm6, %v940_v29, %v942_v55  ;;  %v946_v57 = vsel %vm2259_vm6, %v942_v55, %v944_v54  ;;  %vm2280_vm6 = vcmask 7168  }
 0x2d5   : > { %v949_v58 = vmax.f32 %v937_v52, %v945_v56  ;;  %v950_v59 = vmax.f32 %v938_v53, %v946_v57  ;;  %vm2281_vm5 = vmmov %vm2280_vm6 }
 0x2d7   : > { %v953_v60 = vcombine.low %v949_v58, %v950_v59 }
 0x2d9   : > { %1610 = vst.sshfl [vmem:[#allocation2 + $0x2] sm:$0x33 pattern:$0x76325410] %v953_v60 }
 0x2e0   : > { %v995_v61 = vld [vmem:[#allocation2] sm:$0x3f] }
 0x2e1   : > { %v963_v62 = vld [vmem:[#allocation2 + $0x2] sm:$0x3f]  ;;  %v1004_v63 = vrot.slane %v995_v61, %v1928_v28  ;;  %v997_v8 = vcombine.high %v995_v61, %v995_v61 }
 0x2e2   : > { %v972_v4 = vrot.slane %v963_v62, %v1928_v28  ;;  %v965_v5 = vcombine.high %v963_v62, %v963_v62 }
 0x2e3   : > { %1013 = vrot.lane.b32.xlu0 %v1004_v63, %s1811_s8  ;;  %v1011_v9 = vrot.slane %v997_v8, %v1928_v28  ;;  %v1012_v10 = vcombine.high %v1004_v63, %v1004_v63 }
 0x2e4   : > { %981 = vrot.lane.b32.xlu1 %v972_v4, %s1812_s11  ;;  %v980_v6 = vcombine.high %v972_v4, %v972_v4  ;;  %v979_v7 = vrot.slane %v965_v5, %v1928_v28 }
 0x2e7   : > { %1041 = vrot.lane.b32.xlu0 %v1004_v63, %s1813_s12 }
 0x2e8   : > { %1027 = vrot.lane.b32.xlu1 %v972_v4, %s1814_s13 }
 0x2eb   : > { %983 = vrot.lane.b32.xlu0 %v980_v6, %s1812_s11 }
 0x2ec   : > { %985 = vrot.lane.b32.xlu1 %v979_v7, %s1812_s11 }
 0x2ef   : > { %1017 = vrot.lane.b32.xlu0 %v1011_v9, %s1811_s8 }
 0x2f0   : > { %1015 = vrot.lane.b32.xlu1 %v1012_v10, %s1811_s8 }
 0x2f3   : > { %1029 = vrot.lane.b32.xlu0 %v980_v6, %s1814_s13 }
 0x2f4   : > { %1031 = vrot.lane.b32.xlu1 %v979_v7, %s1814_s13 }
 0x2f7   : > { %1045 = vrot.lane.b32.xlu0 %v1011_v9, %s1813_s12 }
 0x2f8   : > { %1043 = vrot.lane.b32.xlu1 %v1012_v10, %s1813_s12 }
 0x355   : > { %v1014_v12 = vpop.permute.xlu0 %1013 }
 0x356   : > { %v982_v13 = vpop.permute.xlu1 %981 }
 0x359   : > { %v1042_v14 = vpop.permute.xlu0 %1041 }
 0x35a   : > { %v1028_v15 = vpop.permute.xlu1 %1027 }
 0x35d   : > { %v984_v16 = vpop.permute.xlu0 %983 }
 0x35e   : > { %v986_v17 = vpop.permute.xlu1 %985  ;;  %v987_v18 = vsel %vm664_vm10, %v982_v13, %v984_v16 }
 0x35f   : > { %v988_v19 = vsel %vm664_vm10, %v984_v16, %v986_v17  ;;  %v991_v24 = vsel %vm1984_vm12, %v987_v18, -inf }
 0x360   : > { %v992_v25 = vsel %vm1988_vm13, %v988_v19, -inf  ;;  %v993_v32 = vmax.f32 %v949_v58, %v991_v24 }
 0x361   : > { %v1018_v20 = vpop.permute.xlu0 %1017  ;;  %v994_v33 = vmax.f32 %v950_v59, %v992_v25 }
 0x362   : > { %v1016_v21 = vpop.permute.xlu1 %1015 }
 0x363   : > { %v1019_v22 = vsel %vm2280_vm6, %v1014_v12, %v1016_v21  ;;  %v1020_v23 = vsel %vm2281_vm5, %v1016_v21, %v1018_v20  ;;  %vm2282_vm5 = vcmask 785408  }
 0x364   : > { %v1023_v26 = vsel %vm1995_vm15, %v1019_v22, -inf  ;;  %v1024_v29 = vsel %vm1999_vm0, %v1020_v23, -inf  ;;  %vm2283_vm6 = vmmov %vm2282_vm5 }
 0x365   : > { %v1030_v30 = vpop.permute.xlu0 %1029  ;;  %v1025_v40 = vmax.f32 %v993_v32, %v1023_v26  ;;  %v1026_v41 = vmax.f32 %v994_v33, %v1024_v29 }
 0x366   : > { %v1032_v31 = vpop.permute.xlu1 %1031  ;;  %v1033_v36 = vsel %vm734_vm1, %v1028_v15, %v1030_v30 }
 0x367   : > { %v1034_v37 = vsel %vm734_vm1, %v1030_v30, %v1032_v31  ;;  %v1037_v38 = vsel %vm2009_vm7, %v1033_v36, -inf }
 0x368   : > { %v1038_v39 = vsel %vm2013_vm8, %v1034_v37, -inf  ;;  %v1039_v46 = vmax.f32 %v1025_v40, %v1037_v38 }
 0x369   : > { %v1046_v42 = vpop.permute.xlu0 %1045  ;;  %v1040_v47 = vmax.f32 %v1026_v41, %v1038_v39 }
 0x36a   : > { %v1044_v45 = vpop.permute.xlu1 %1043 }
 0x36b   : > { %v1047_v48 = vsel %vm431_vm9, %v1042_v14, %v1044_v45  ;;  %v1048_v50 = vsel %vm431_vm9, %v1044_v45, %v1046_v42 }
 0x36c   : > { %v1051_v51 = vsel %vm2029_vm11, %v1047_v48, -inf  ;;  %v1052_v52 = vsel %vm2033_vm14, %v1048_v50, -inf }
 0x36d   : > { %v1053_v53 = vmax.f32 %v1039_v46, %v1051_v51  ;;  %v1054_v54 = vmax.f32 %v1040_v47, %v1052_v52  ;;  %v1605_v51 = vld [vmem:[%s2255_s4 + $0x4] sm:$0xf]  ;;  %v1611_v52 = vld [vmem:[%s2255_s4 + $0x8] sm:$0xf] }
 0x36e   : > { %1608 = vmatmul.mubr.msk.f32.vlgmr.msra.gmra.mrb[2].mxu0 %vm431_vm9, %v1605_v51 }
 0x36f   : > { %v1144_v55 = vcombine.low %v1053_v53, %v1054_v54  ;;  %1612 = vmatprep.subr.msk.mxu1 %vm2261_vm2, %v1054_v54  ;;  %1418 = vmatprep.mubr.f32.mxu0 %v1803_v0 }
 0x370   : > { %1613 = vmatpush1.msk.msra.mxu1 %vm2261_vm2, %v1053_v53  ;;  %vm2284_vm2 = vcmask 261120  }
 0x371   : > { %1615 = vst.sshfl [vmem:[#allocation2 + $0x2] sm:$0x33 pattern:$0x76325410] %v1144_v55  ;;  %1614 = vmatmul.mubr.msk.f32.vlgmr.msra.gmra.mrb[2].mxu1 %vm431_vm9, %v1611_v52  ;;  %v1435_v55 = vld [vmem:[%s2256_s5] sm:$0xf] }
 0x378   : > { %v1184_v56 = vld [vmem:[#allocation2] sm:$0x3f] }
 0x379   : > { %v1154_v57 = vld [vmem:[#allocation2 + $0x2] sm:$0x3f]  ;;  %v1193_v58 = vrot.slane %v1184_v56, %v1928_v28  ;;  %v1186_v63 = vcombine.high %v1184_v56, %v1184_v56 }
 0x37a   : > { %v1163_v59 = vrot.slane %v1154_v57, %v1928_v28  ;;  %v1156_v60 = vcombine.high %v1154_v57, %v1154_v57 }
 0x37b   : > { %1202 = vrot.lane.b32.xlu0 %v1193_v58, %s1809_s28  ;;  %v1200_v4 = vrot.slane %v1186_v63, %v1928_v28  ;;  %v1201_v5 = vcombine.high %v1193_v58, %v1193_v58 }
 0x37c   : > { %1172 = vrot.lane.b32.xlu1 %v1163_v59, %s1808_s27  ;;  %v1171_v61 = vcombine.high %v1163_v59, %v1163_v59  ;;  %v1170_v62 = vrot.slane %v1156_v60, %v1928_v28 }
 0x37f   : > { %1226 = vrot.lane.b32.xlu0 %v1193_v58, %s1810_s30 }
 0x380   : > { %1214 = vrot.lane.b32.xlu1 %v1163_v59, %s1807_s20 }
 0x383   : > { %1174 = vrot.lane.b32.xlu0 %v1171_v61, %s1808_s27 }
 0x384   : > { %1176 = vrot.lane.b32.xlu1 %v1170_v62, %s1808_s27 }
 0x387   : > { %1206 = vrot.lane.b32.xlu0 %v1200_v4, %s1809_s28 }
 0x388   : > { %1204 = vrot.lane.b32.xlu1 %v1201_v5, %s1809_s28  ;;  %s1727_s28 = sshll.u32 %s1816_s24, 4  ;;  %s1728_s28 = int_to_ptr.vmem [resolvable:$false] %s1727_s28 }
 0x38b   : > { %1216 = vrot.lane.b32.xlu0 %v1171_v61, %s1807_s20 }
 0x38c   : > { %1218 = vrot.lane.b32.xlu1 %v1170_v62, %s1807_s20 }
 0x38f   : > { %1230 = vrot.lane.b32.xlu0 %v1200_v4, %s1810_s30 }
 0x390   : > { %1228 = vrot.lane.b32.xlu1 %v1201_v5, %s1810_s30  ;;  %s1729_s30 = scalar_lea.vmem %s1728_s28, 256 }
 0x3ed   : > { %v1203_v6 = vpop.permute.xlu0 %1202 }
 0x3ee   : > { %v1173_v7 = vpop.permute.xlu1 %1172 }
 0x3f1   : > { %v1227_v8 = vpop.permute.xlu0 %1226 }
 0x3f2   : > { %v1215_v9 = vpop.permute.xlu1 %1214 }
 0x3f5   : > { %v1175_v10 = vpop.permute.xlu0 %1174 }
 0x3f6   : > { %v1177_v11 = vpop.permute.xlu1 %1176  ;;  %v1178_v14 = vsel %vm553_vm3, %v1173_v7, %v1175_v10 }
 0x3f7   : > { %v1179_v15 = vsel %vm553_vm3, %v1175_v10, %v1177_v11  ;;  %v1182_v18 = vmax.f32 %v1053_v53, %v1178_v14  ;;  %vm2285_vm3 = vmmov %vm2284_vm2 }
 0x3f8   : > { %v1183_v19 = vmax.f32 %v1054_v54, %v1179_v15  ;;  %v508_v54 = vpop.f32.mrb[0].mxu1 }
 0x3f9   : > { %v1207_v12 = vpop.permute.xlu0 %1206  ;;  %v510_v0 = vpop.f32.mrb[1].mxu1 }
 0x3fa   : > { %v1205_v13 = vpop.permute.xlu1 %1204 }
 0x3fb   : > { %v1208_v16 = vsel %vm584_vm4, %v1203_v6, %v1205_v13  ;;  %v1209_v17 = vsel %vm584_vm4, %v1205_v13, %v1207_v12 }
 0x3fc   : > { %v1212_v24 = vmax.f32 %v1182_v18, %v1208_v16  ;;  %v1213_v25 = vmax.f32 %v1183_v19, %v1209_v17 }
 0x3fd   : > { %v1217_v20 = vpop.permute.xlu0 %1216 }
 0x3fe   : > { %v1219_v21 = vpop.permute.xlu1 %1218  ;;  %v1220_v22 = vsel %vm2282_vm5, %v1215_v9, %v1217_v20 }
 0x3ff   : > { %v1221_v23 = vsel %vm2283_vm6, %v1217_v20, %v1219_v21  ;;  %v1224_v26 = vmax.f32 %v1212_v24, %v1220_v22 }
 0x400   : > { %v1225_v29 = vmax.f32 %v1213_v25, %v1221_v23 }
 0x401   : > { %v1231_v30 = vpop.permute.xlu0 %1230 }
 0x402   : > { %v1229_v31 = vpop.permute.xlu1 %1228 }
 0x403   : > { %v1232_v32 = vsel %vm2284_vm2, %v1227_v8, %v1229_v31  ;;  %v1233_v33 = vsel %vm2285_vm3, %v1229_v31, %v1231_v30  ;;  %vm2286_vm2 = vcmask 7168  }
 0x404   : > { %v1236_v36 = vmax.f32 %v1224_v26, %v1232_v32  ;;  %v1237_v37 = vmax.f32 %v1225_v29, %v1233_v33  ;;  %vm2287_vm4 = vmmov %vm2286_vm2 }
 0x406   : > { %v1240_v38 = vcombine.low %v1236_v36, %v1237_v37 }
 0x408   : > { %1616 = vst.sshfl [vmem:[#allocation2 + $0x2] sm:$0x33 pattern:$0x76325410] %v1240_v38 }
 0x40f   : > { %v1282_v39 = vld [vmem:[#allocation2] sm:$0x3f] }
 0x410   : > { %v1250_v40 = vld [vmem:[#allocation2 + $0x2] sm:$0x3f]  ;;  %v1291_v41 = vrot.slane %v1282_v39, %v1928_v28  ;;  %v1284_v50 = vcombine.high %v1282_v39, %v1282_v39 }
 0x411   : > { %v1259_v42 = vrot.slane %v1250_v40, %v1928_v28  ;;  %v1252_v45 = vcombine.high %v1250_v40, %v1250_v40 }
 0x412   : > { %1300 = vrot.lane.b32.xlu0 %v1291_v41, %s1811_s8  ;;  %v1299_v48 = vcombine.high %v1291_v41, %v1291_v41  ;;  %v1298_v53 = vrot.slane %v1284_v50, %v1928_v28 }
 0x413   : > { %1268 = vrot.lane.b32.xlu1 %v1259_v42, %s1812_s11  ;;  %v1266_v46 = vrot.slane %v1252_v45, %v1928_v28  ;;  %v1267_v47 = vcombine.high %v1259_v42, %v1259_v42  ;;  %v515_v28 = vcombine.low %v508_v54, %v510_v0 }
 0x416   : > { %1272 = vrot.lane.b32.xlu0 %v1266_v46, %s1812_s11 }
 0x417   : > { %1314 = vrot.lane.b32.xlu1 %v1259_v42, %s1814_s13 }
 0x41a   : > { %1302 = vrot.lane.b32.xlu0 %v1299_v48, %s1811_s8 }
 0x41b   : > { %1270 = vrot.lane.b32.xlu1 %v1267_v47, %s1812_s11 }
 0x41e   : > { %1318 = vrot.lane.b32.xlu0 %v1266_v46, %s1814_s13 }
 0x41f   : > { %1304 = vrot.lane.b32.xlu1 %v1298_v53, %s1811_s8 }
 0x422   : > { %1330 = vrot.lane.b32.xlu0 %v1299_v48, %s1813_s12 }
 0x423   : > { %1316 = vrot.lane.b32.xlu1 %v1267_v47, %s1814_s13 }
 0x426   : > { %1328 = vrot.lane.b32.xlu0 %v1291_v41, %s1813_s12 }
 0x427   : > { %1332 = vrot.lane.b32.xlu1 %v1298_v53, %s1813_s12  ;;  %s293_s12 = sand.u32 1, %s1785_s22  }
 0x428   : > { %s1592_s13 = sshll.u32 %s293_s12, 3  ;;  %s1458_s20 = scalar_lea.sflag [#allocation5], %s293_s12 }
 0x429   : > { %s295_s15 = scalar_lea.vmem [#allocation4], %s1592_s13 }
 0x42a   : > { %s1472_s16 = sshll.u32 %s295_s15, 4  ;;  %s2206_s16 = int_to_ptr.vmem [resolvable:$true] %s1472_s16 }
 0x42b   : > { %1438 = vperm.xlu1 %1698, %v1435_v55   ;;  %s1723_s27 = scalar_lea.vmem %s2206_s16, 128  ;;  %p1730_p1 = scmp.lt.s32.totalorder %s2206_s16, %s1728_s28 }
 0x42c   : > { %p1724_p12 = scmp.ne.s32.totalorder %s2206_s16, %s1723_s27  ;;  %p1731_p2 = scmp.lt.s32.totalorder %s1729_s30, %s1723_s27 }
 0x42e   : > { %p1725_p13 = pnand %p1724_p12, %p1892_p4  ;;  %p1732_p3 = por %p1731_p2, %p1730_p1 }
 0x430   : > { %p1726_p0 = pneg %p1725_p13 }
 0x432   : > { %p1733_p5 = pnand %p1732_p3, %p1726_p0 }
 0x441   : > { %v846_v29 = vpop.f32.mrb[2].mxu0 }
 0x442   : > { %v848_v30 = vpop.f32.mrb[3].mxu0 }
 0x443   : > { %v853_v31 = vcombine.low %v846_v29, %v848_v30 }
 0x444   : > { %v1133_v3 = vpop.f32.mrb[2].mxu1 }
 0x445   : > { %v1135_v32 = vpop.f32.mrb[3].mxu1  ;;  %v855_v33 = vadd.f32 %v853_v31, %v515_v28 }
 0x446   : > { %v1140_v1 = vcombine.low %v1133_v3, %v1135_v32 }
 0x484   : > { %v1301_v56 = vpop.permute.xlu0 %1300 }
 0x485   : > { %v1269_v57 = vpop.permute.xlu1 %1268 }
 0x488   : > { %v1273_v59 = vpop.permute.xlu0 %1272 }
 0x489   : > { %v1315_v58 = vpop.permute.xlu1 %1314 }
 0x48c   : > { %v1303_v61 = vpop.permute.xlu0 %1302 }
 0x48d   : > { %v1271_v60 = vpop.permute.xlu1 %1270  ;;  %v1306_v10 = vsel %vm2287_vm4, %v1301_v56, %v1303_v61 }
 0x48e   : > { %v1274_v62 = vsel %vm664_vm10, %v1269_v57, %v1271_v60  ;;  %v1275_v63 = vsel %vm664_vm10, %v1271_v60, %v1273_v59  ;;  %v1310_v16 = vsel %vm1995_vm15, %v1306_v10, -inf  ;;  %vm2288_vm10 = vcmask 1041408  }
 0x48f   : > { %v1278_v4 = vsel %vm1984_vm12, %v1274_v62, -inf  ;;  %v1279_v8 = vsel %vm1988_vm13, %v1275_v63, -inf  ;;  %vm2289_vm12 = vmmov %vm2288_vm10 }
 0x490   : > { %v1319_v6 = vpop.permute.xlu0 %1318  ;;  %v1280_v9 = vmax.f32 %v1236_v36, %v1278_v4  ;;  %v1281_v14 = vmax.f32 %v1237_v37, %v1279_v8  ;;  %v1142_v36 = vadd.f32 %v1140_v1, %v855_v33  ;;  %v1815_v37 = vmov 839922192  }
 0x491   : > { %v1305_v5 = vpop.permute.xlu1 %1304  ;;  %v1441_v38 = vunpack.c.l.s4 %v1815_v37 }
 0x492   : > { %v1307_v7 = vsel %vm2286_vm2, %v1303_v61, %v1305_v5  ;;  %v1312_v18 = vmax.f32 %v1280_v9, %v1310_v16 }
 0x493   : > { %v1311_v11 = vsel %vm1999_vm0, %v1307_v7, -inf  ;;  %v1442_v39 = vunpack.c.0.s8 %v1441_v38 }
 0x494   : > { %v1331_v13 = vpop.permute.xlu0 %1330  ;;  %v1313_v19 = vmax.f32 %v1281_v14, %v1311_v11 }
 0x495   : > { %v1317_v12 = vpop.permute.xlu1 %1316  ;;  %v1445_v40 = vsub.s32 %v1442_v39, %v1925_v27 }
 0x496   : > { %v1320_v15 = vsel %vm734_vm1, %v1315_v58, %v1317_v12  ;;  %v1321_v34 = vsel %vm734_vm1, %v1317_v12, %v1319_v6 }
 0x497   : > { %v1324_v35 = vsel %vm2009_vm7, %v1320_v15, -inf  ;;  %v1325_v17 = vsel %vm2013_vm8, %v1321_v34, -inf }
 0x498   : > { %v1329_v20 = vpop.permute.xlu0 %1328  ;;  %v1326_v21 = vmax.f32 %v1312_v18, %v1324_v35  ;;  %v1327_v22 = vmax.f32 %v1313_v19, %v1325_v17 }
 0x499   : > { %v1333_v44 = vpop.permute.xlu1 %1332  ;;  %v1334_v24 = vsel %vm431_vm9, %v1329_v20, %v1331_v13 }
 0x49a   : > { %v1335_v23 = vsel %vm431_vm9, %v1331_v13, %v1333_v44  ;;  %v1338_v2 = vsel %vm2029_vm11, %v1334_v24, -inf }
 0x49b   : > { %v1339_v43 = vsel %vm2033_vm14, %v1335_v23, -inf  ;;  %v1340_v26 = vmax.f32 %v1326_v21, %v1338_v2 }
 0x49c   : > { %v1341_v25 = vmax.f32 %v1327_v22, %v1339_v43 }
 0x49e   : > { %1618 = vmatprep.subr.msk.mxu0 %vm2288_vm10, %v1341_v25 }
 0x49f   : > { %1619 = vmatpush1.msk.msra.mxu0 %vm2289_vm12, %v1340_v26 }
 0x4a0   : > { %1620 = vmatmul.mubr.msk.f32.vlgmr.msra.gmra.mrb[4].mxu0 %vm431_vm9, %v1617_v49 }
 0x4aa   : > { %v1439_v41 = vpop.permute.xlu1 %1438 }
 0x4ab   : > { %v1446_v47 = vrot.slane %v1439_v41, %v1445_v40 }
 0x573   : > { %v1420_v42 = vpop.f32.mrb[4].mxu0 }
 0x574   : > { %v1422_v45 = vpop.f32.mrb[5].mxu0 }
 0x575   : > { %v1427_v46 = vcombine.low %v1420_v42, %v1422_v45 }
 0x577   : > { %v1429_v48 = vadd.f32 %v1427_v46, %v1142_v36 }
 0x579   : > { %v1448_v50 = vadd.f32 %v1446_v47, %v1429_v48 }
 0x57b   : > { %v1621_v51 = vmul.f32 -1.442695, %v1448_v50 }
 0x57d   : > { %1719 = vpow2.f32 %v1621_v51 }
 0x587   : > { %v1720_v52 = vpop.eup %1719 }
 0x588   : > { %v1452_v53 = vadd.f32 1.0, %v1720_v52 }
 0x58a   : > { %1721 = vrcp.f32 %v1452_v53 }
 0x594   : > { %v1722_v54 = vpop.eup %1721 }
 0x595   : > { %v1455_v27 = vmul.f32 %v1722_v54, %v1448_v50 }
 0x597   : > { %1456 = vst [vmem:[%s295_s15] sm:$0xff] %v1455_v27 }
 0x598   : > { %1736 = shalt.err (!%p1733_p5)
}
 0x599   : > { %s1737_s8 = scalar_lea.hbm %s2204_s19, 128  ;;  %s1741_s13 = scalar_lea.hbm %s2257_s6, 256 }
 0x59a   : > { %p1738_p6 = scmp.ne.s32.totalorder %s2204_s19, %s1737_s8  ;;  %p1742_p10 = scmp.lt.u32.totalorder %s2204_s19, %s2257_s6 }
 0x59b   : > { %p1743_p11 = scmp.lt.u32.totalorder %s1741_s13, %s1737_s8  ;;  %p1745_p13 = scmp.lt.u32.totalorder %s1737_s8, %s2204_s19 }
 0x59c   : > { %p1739_p7 = pnand %p1738_p6, %p1892_p4 }
 0x59d   : > { %p1744_p12 = por %p1743_p11, %p1742_p10 }
 0x59e   : > { %p1740_p9 = pneg %p1739_p7 }
 0x59f   : > { %p1746_p0 = por %p1745_p13, %p1744_p12 }
 0x5a1   : > { %p1747_p1 = pnand %p1746_p0, %p1740_p9 }
 0x5a3   : > { %1750 = shalt.err (!%p1747_p1)
}
 0x5a4   : > { %1629 = dma.vmem_to_hbm [thread:$0]  (%p1892_p4), %s2206_s16, 128, %s2204_s19, %s1458_s20  }
 0x5a5 PF: > { %p1635_p2 = scmp.ge.s32.totalorder %s1801_s26, 2  ;;  %s1484_s17 = sand.u32 1, %s1781_s21  }
 0x5a6   : > { %s1485_s18 = scalar_lea.sflag [#allocation5], %s1484_s17 }
 0x5a7   : > { %p1632_p3 = pnand %p1635_p2, %p1899_p8 }
 0x5a9   : > { %1776 = dma.done.wait (!%p1632_p3), %s1485_s18, 128  }
 0x5aa   : > { %1778 = vsyncadd (!%p1632_p3), %s1485_s18, 4294967168  ;;  %s19_s26 = sadd.s32 1, %s1801_s26   ;;  %s2290_s21 = smov %s1785_s22 }
 0x5ab   : > { %p16_p5 = scmp.ge.s32.totalorder %s19_s26, 4   ;;  %s2291_s22 = smov %s1789_s23 }
 0x5ac   : > { %s2292_s23 = smov %s1905_s10  ;;  %s2293_s24 = smov %s1797_s25 }
 0x5ad   : > { %s2294_s25 = smov %s2296_s29  ;;  %18 = sbr.rel (!%p16_p5) target bundleno = 4 (0x4), region = 99 }
 0x5b4   :  { %1490 = vsyncpa [#allocation5], 1 }
 0x5b5   :  { %1492 = vsyncpa [#allocation5 + $0x1], 1 }

</bundles_post_ra>
